<compile_context>
chip_gen: v5e
topology: v5e:2x2
jax: 0.10.0
libtpu: 0.0.40
codegen_flags: <defaults>
</compile_context>

<pallas_src>
import functools

import jax
import jax.numpy as jnp
from jax import lax
from jax.experimental import pallas as pl
from jax.experimental.pallas import tpu as pltpu

SCENE_PT_MLP = [4, 64, 128, 256]
GLOBAL_MLP = [256, 512, 1024, 2048]
NUM_GROUPS = 16
LEAKY_SLOPE = 0.01   # nn.LeakyReLU default
GN_EPS = 1e-5        # nn.GroupNorm default


# --------------------------------------------------------------------------------------
# Kernel 1: point MLP + one-hot voxel scatter_add + per-batch voxel max  ->  (B, 256)
# --------------------------------------------------------------------------------------
def _point_voxel_kernel(pc_ref, crd_ref,
                        w1_ref, b1_ref, w2_ref, b2_ref, w3_ref, b3_ref,
                        feat_ref, vox_acc_ref,
                        *, lo, vs, nvox, vpad):
    n = pl.program_id(1)
    Bt, Nt, C = pc_ref.shape
    M = Bt * Nt
    V = nvox[0] * nvox[1] * nvox[2]

    @pl.when(n == 0)
    def _():
        # torch initializes the scatter target with zeros, so empty (and padded) voxels
        # contribute exactly 0 to the later max (valid because h >= 0 after ReLU).
        vox_acc_ref[...] = jnp.zeros_like(vox_acc_ref)

    # ---- voxel_inds, lane-dense (Bt, Nt): floor((xyz - bounds[0]) / vox_size) --------
    crd = crd_ref[...]                                                   # (Bt, 3, Nt) f32
    ix = jnp.floor((crd[:, 0, :] - lo[0]) / vs[0]).astype(jnp.int32)     # (Bt, Nt)
    iy = jnp.floor((crd[:, 1, :] - lo[1]) / vs[1]).astype(jnp.int32)
    iz = jnp.floor((crd[:, 2, :] - lo[2]) / vs[2]).astype(jnp.int32)
    flat = ix * (nvox[1] * nvox[2]) + iy * nvox[2] + iz                  # (Bt, Nt)
    valid = jnp.logical_and(flat >= 0, flat < V)
    target = jnp.where(valid, flat, -1)                                  # (Bt, Nt)

    # ---- shared point-wise MLP: 1x1 conv (+bias) + ReLU (bf16 MXU, f32 accumulate) ---
    pc = pc_ref[...].reshape(M, C)                                       # (M, 4) f32
    h = pc.astype(jnp.bfloat16)
    h = jnp.maximum(
        jnp.dot(h, w1_ref[...], preferred_element_type=jnp.float32) + b1_ref[...], 0.0)
    h = jnp.maximum(
        jnp.dot(h.astype(jnp.bfloat16), w2_ref[...],
                preferred_element_type=jnp.float32) + b2_ref[...], 0.0)
    h = jnp.maximum(
        jnp.dot(h.astype(jnp.bfloat16), w3_ref[...],
                preferred_element_type=jnp.float32) + b3_ref[...], 0.0)
    # h: (M, 256) f32, non-negative.

    # ---- per-batch scatter_add via transposed one-hot matmul -------------------------
    # one_hot_t[r, m] = (r == target_b[m]); vox_acc[b, r, c] += sum_m one_hot_t[r, m] * h_b[m, c]
    row_iota = lax.broadcasted_iota(jnp.int32, (vpad, Nt), 0)            # hoisted (no CSE)
    for b in range(Bt):
        one_hot_t = (row_iota == target[b:b + 1, :]).astype(jnp.bfloat16)   # (vpad, Nt)
        h_b = h[b * Nt:(b + 1) * Nt, :].astype(jnp.bfloat16)                # (Nt, 256)
        vox_acc_ref[b] += jnp.dot(one_hot_t, h_b,
                                  preferred_element_type=jnp.float32)       # (vpad, 256)

    @pl.when(n == pl.num_programs(1) - 1)
    def _():
        # max over voxels per sub-batch (single fused sublane reduction).
        feat_ref[...] = jnp.max(vox_acc_ref[...], axis=1).reshape(feat_ref.shape)


# --------------------------------------------------------------------------------------
# Kernel 2: global feature extractor  (Linear + GroupNorm + LeakyReLU) x2 + Linear
# --------------------------------------------------------------------------------------
def _leaky_relu(x):
    return jnp.where(x >= 0.0, x, LEAKY_SLOPE * x)


def _group_norm(x, gamma, beta, g_mat, gt_mat, eps=GN_EPS):
    """GroupNorm over (Bg, C) rows using group-indicator matmuls (f32, centered var)."""
    gsize = x.shape[-1] // g_mat.shape[-1]
    mean_g = jnp.dot(x, g_mat, preferred_element_type=jnp.float32) / gsize        # (Bg, G)
    mean = jnp.dot(mean_g, gt_mat, preferred_element_type=jnp.float32)            # (Bg, C)
    xc = x - mean
    var_g = jnp.dot(xc * xc, g_mat, preferred_element_type=jnp.float32) / gsize   # (Bg, G)
    var = jnp.dot(var_g, gt_mat, preferred_element_type=jnp.float32)              # (Bg, C)
    return xc * lax.rsqrt(var + eps) * gamma + beta


def _global_mlp_kernel(feat_ref,
                       gw1_ref, gb1_ref, gn1w_ref, gn1b_ref,
                       gw2_ref, gb2_ref, gn2w_ref, gn2b_ref,
                       gw3_ref, gb3_ref,
                       g1_ref, g1t_ref, g2_ref, g2t_ref,
                       out_ref):
    g = jnp.dot(feat_ref[...].astype(jnp.bfloat16), gw1_ref[...],
                preferred_element_type=jnp.float32) + gb1_ref[...]
    g = _group_norm(g, gn1w_ref[...], gn1b_ref[...], g1_ref[...], g1t_ref[...])
    g = _leaky_relu(g)
    g = jnp.dot(g.astype(jnp.bfloat16), gw2_ref[...],
                preferred_element_type=jnp.float32) + gb2_ref[...]
    g = _group_norm(g, gn2w_ref[...], gn2b_ref[...], g2_ref[...], g2t_ref[...])
    g = _leaky_relu(g)
    out_ref[...] = jnp.dot(g.astype(jnp.bfloat16), gw3_ref[...],
                           preferred_element_type=jnp.float32) + gb3_ref[...]


# --------------------------------------------------------------------------------------
# Host-side helpers / wrapper
# --------------------------------------------------------------------------------------
def _group_indicators(C, num_groups):
    gsize = C // num_groups
    g_of_c = jnp.arange(C, dtype=jnp.int32) // gsize
    gids = jnp.arange(num_groups, dtype=jnp.int32)
    G = (g_of_c[:, None] == gids[None, :]).astype(jnp.float32)           # (C, G)
    return G, jnp.transpose(G)                                           # (C,G), (G,C)


def _default_vmem_limit():
    try:
        cap = int(pltpu.get_tpu_info().vmem_capacity_bytes)
        # ~51 MiB on v7x (64 MiB physical), ~102 MiB on v5e/v6e (128 MiB physical).
        return max(32 << 20, min(int(cap * 0.8), cap - (8 << 20)))
    except Exception:
        return 48 << 20


def _pick_point_tile(N):
    for nt in (2048, 1024, 512, 256, 128):
        if N % nt == 0:
            return nt
    return N


def _pick_batch_tile(B, vpad, vox_budget_bytes):
    # Keep B // Bt >= 2 whenever possible so both TensorCores get work on v7x, and
    # keep the (Bt, vpad, 256) f32 voxel accumulator within its VMEM budget.
    cap = min(4, max(1, B // 2)) if B >= 2 else 1
    for bt in range(cap, 0, -1):
        if B % bt == 0 and bt * vpad * SCENE_PT_MLP[-1] * 4 <= vox_budget_bytes:
            return bt
    return 1


def _pick_row_tile(B, cap=512):
    if B <= cap:
        return B
    for t in range(cap, 7, -1):
        if B % t == 0 and t % 8 == 0:
            return t
    return B


def simple_scene_net_forward(scene_pc, params, bounds, vox_size,
                             *, batch_tile=None, point_tile=None):
    """scene_pc: (B, N, 4) float32.  Returns (B, 2048) float32."""
    B, N, C = scene_pc.shape
    assert C == SCENE_PT_MLP[0]

    lo = tuple(float(x) for x in bounds[0])
    hi = tuple(float(x) for x in bounds[1])
    vs = tuple(float(x) for x in vox_size)
    # ((bounds[1] - bounds[0]) / vox_size).long()  -> trunc toward zero (positive here)
    nvox = tuple(int((hi[i] - lo[i]) / vs[i]) for i in range(3))
    V = nvox[0] * nvox[1] * nvox[2]
    vpad = max(8, ((V + 7) // 8) * 8)            # sublane-aligned per-batch voxel stride

    vmem_limit = _default_vmem_limit()

    Nt = point_tile if point_tile is not None else _pick_point_tile(N)
    assert N % Nt == 0 and (Nt % 128 == 0 or Nt == N), \
        "point_tile must divide N and be a multiple of 128 (or equal N)"
    Bt = batch_tile if batch_tile is not None else _pick_batch_tile(B, vpad, vmem_limit // 3)
    assert B % Bt == 0, "batch size must be divisible by batch_tile"

    # Lane-dense coordinate view for the voxel-index math (one tiny XLA transpose).
    coords = jnp.transpose(scene_pc[..., 0:3], (0, 2, 1))                # (B, 3, N)

    def bf16(k):
        return params[k].astype(jnp.bfloat16)

    pt_params = [bf16("w1"), params["b1"], bf16("w2"), params["b2"],
                 bf16("w3"), params["b3"]]

    def const_spec2(arr):                       # constant block over a 2-D grid
        nd = arr.ndim
        return pl.BlockSpec(arr.shape, lambda b, n, _nd=nd: (0,) * _nd)

    kernel1 = functools.partial(_point_voxel_kernel, lo=lo, vs=vs, nvox=nvox, vpad=vpad)

    # NOTE: the (Bt, Nt, 4) channels-last input tile pads its last dim to 128 lanes in
    # VMEM (~Bt*Nt*512 bytes per pipeline buffer) — small for the tiles used here.
    feat = pl.pallas_call(
        kernel1,
        out_shape=jax.ShapeDtypeStruct((B // Bt, Bt, SCENE_PT_MLP[-1]), jnp.float32),
        grid_spec=pltpu.PrefetchScalarGridSpec(
            num_scalar_prefetch=0,
            grid=(B // Bt, N // Nt),
            in_specs=[pl.BlockSpec((Bt, Nt, C), lambda b, n: (b, n, 0)),
                      pl.BlockSpec((Bt, 3, Nt), lambda b, n: (b, 0, n))]
                     + [const_spec2(p) for p in pt_params],
            out_specs=pl.BlockSpec((1, Bt, SCENE_PT_MLP[-1]), lambda b, n: (b, 0, 0)),
            scratch_shapes=[pltpu.VMEM((Bt, vpad, SCENE_PT_MLP[-1]), jnp.float32)]),
        compiler_params=pltpu.CompilerParams(
            # batch tiles are independent -> shard across TensorCores on v7x;
            # point tiles accumulate into the voxel scratch -> "arbitrary".
            dimension_semantics=("parallel", "arbitrary"),
            vmem_limit_bytes=vmem_limit),
    )(scene_pc, coords, *pt_params)
    feat = feat.reshape(B, SCENE_PT_MLP[-1])                             # (B, 256)

    # ---- global feature extractor over all B rows at once ---------------------------
    G1, G1T = _group_indicators(GLOBAL_MLP[1], NUM_GROUPS)
    G2, G2T = _group_indicators(GLOBAL_MLP[2], NUM_GROUPS)
    g_params = [bf16("gw1"), params["gb1"], params["gn1w"], params["gn1b"],
                bf16("gw2"), params["gb2"], params["gn2w"], params["gn2b"],
                bf16("gw3"), params["gb3"], G1, G1T, G2, G2T]

    Bg = _pick_row_tile(B)

    def const_spec1(arr):                       # constant block over a 1-D grid
        nd = arr.ndim
        return pl.BlockSpec(arr.shape, lambda i, _nd=nd: (0,) * _nd)

    out = pl.pallas_call(
        _global_mlp_kernel,
        out_shape=jax.ShapeDtypeStruct((B, GLOBAL_MLP[-1]), jnp.float32),
        grid_spec=pltpu.PrefetchScalarGridSpec(
            num_scalar_prefetch=0,
            grid=(B // Bg,),
            in_specs=[pl.BlockSpec((Bg, GLOBAL_MLP[0]), lambda i: (i, 0))]
                     + [const_spec1(p) for p in g_params],
            out_specs=pl.BlockSpec((Bg, GLOBAL_MLP[-1]), lambda i: (i, 0))),
        compiler_params=pltpu.CompilerParams(
            dimension_semantics=("arbitrary",),
            vmem_limit_bytes=vmem_limit),
    )(feat, *g_params)
    return out


def init_params(key):
    """Deterministic synthetic parameters (weights stored as (in, out) for x @ W)."""
    keys = jax.random.split(key, 6)

    def linear(k, din, dout):
        kw, kb = jax.random.split(k)
        s = 1.0 / (din ** 0.5)
        w = jax.random.uniform(kw, (din, dout), jnp.float32, -s, s)
        b = jax.random.uniform(kb, (1, dout), jnp.float32, -s, s)
        return w, b

    p = {}
    p["w1"], p["b1"] = linear(keys[0], SCENE_PT_MLP[0], SCENE_PT_MLP[1])
    p["w2"], p["b2"] = linear(keys[1], SCENE_PT_MLP[1], SCENE_PT_MLP[2])
    p["w3"], p["b3"] = linear(keys[2], SCENE_PT_MLP[2], SCENE_PT_MLP[3])
    p["gw1"], p["gb1"] = linear(keys[3], GLOBAL_MLP[0], GLOBAL_MLP[1])
    p["gw2"], p["gb2"] = linear(keys[4], GLOBAL_MLP[1], GLOBAL_MLP[2])
    p["gw3"], p["gb3"] = linear(keys[5], GLOBAL_MLP[2], GLOBAL_MLP[3])
    # GroupNorm affine params (nn.GroupNorm default init: gamma=1, beta=0)
    p["gn1w"] = jnp.ones((1, GLOBAL_MLP[1]), jnp.float32)
    p["gn1b"] = jnp.zeros((1, GLOBAL_MLP[1]), jnp.float32)
    p["gn2w"] = jnp.ones((1, GLOBAL_MLP[2]), jnp.float32)
    p["gn2b"] = jnp.zeros((1, GLOBAL_MLP[2]), jnp.float32)
    return p


if __name__ == "__main__":
    key = jax.random.PRNGKey(0)
    kp, kx, kf = jax.random.split(key, 3)

    # scene bounds / voxel grid: unit cube, 0.25 voxels -> num_voxels = (4, 4, 4), V = 64
    bounds = ((0.0, 0.0, 0.0), (1.0, 1.0, 1.0))
    vox_size = (0.25, 0.25, 0.25)

    B, N = 4, 256
    xyz = jax.random.uniform(kx, (B, N, 3), jnp.float32, 0.0, 1.0 - 1e-4)
    feat = jax.random.normal(kf, (B, N, 1), jnp.float32)
    scene_pc = jnp.concatenate([xyz, feat], axis=-1)        # (B, N, 4)

    params = init_params(kp)

    # batch_tile=2 / point_tile=128 exercise the parallel batch axis (2 tiles, one per
    # TensorCore on v7x) and the N-tile accumulation path (grid = (2, 2)).
    out = simple_scene_net_forward(scene_pc, params, bounds, vox_size,
                                   batch_tile=2, point_tile=128)
    out = jax.block_until_ready(out)
    assert out.shape == (B, GLOBAL_MLP[-1]) and out.dtype == jnp.float32
    print("KERNEL_OK")
</pallas_src>

<mosaic_0001>
module attributes {stable_mosaic.version = 11 : i64} {
  func.func @_point_voxel_kernel(%arg0: i32, %arg1: i32, %arg2: memref<2x128x4xf32, #tpu.memory_space<vmem>>, %arg3: memref<2x3x128xf32, #tpu.memory_space<vmem>>, %arg4: memref<4x64xbf16, #tpu.memory_space<vmem>>, %arg5: memref<1x64xf32, #tpu.memory_space<vmem>>, %arg6: memref<64x128xbf16, #tpu.memory_space<vmem>>, %arg7: memref<1x128xf32, #tpu.memory_space<vmem>>, %arg8: memref<128x256xbf16, #tpu.memory_space<vmem>>, %arg9: memref<1x256xf32, #tpu.memory_space<vmem>>, %arg10: memref<1x2x256xf32, #tpu.memory_space<vmem>>, %arg11: memref<2x64x256xf32, #tpu.memory_space<vmem>>) attributes {dimension_semantics = [#tpu.dimension_semantics<parallel>, #tpu.dimension_semantics<arbitrary>], iteration_bounds = array<i64: 2, 2>, scalar_prefetch = 0 : i64, scratch_operands = 1 : i64, tpu.core_type = #tpu.core_type<tc>, window_params = [{transform_indices = @transform_0, window_bounds = array<i64: 2, 128, 4>}, {transform_indices = @transform_1, window_bounds = array<i64: 2, 3, 128>}, {pipeline_mode = #tpu.pipeline_mode<synchronous>, transform_indices = @transform_2, window_bounds = array<i64: 4, 64>}, {pipeline_mode = #tpu.pipeline_mode<synchronous>, transform_indices = @transform_3, window_bounds = array<i64: 1, 64>}, {pipeline_mode = #tpu.pipeline_mode<synchronous>, transform_indices = @transform_4, window_bounds = array<i64: 64, 128>}, {pipeline_mode = #tpu.pipeline_mode<synchronous>, transform_indices = @transform_5, window_bounds = array<i64: 1, 128>}, {pipeline_mode = #tpu.pipeline_mode<synchronous>, transform_indices = @transform_6, window_bounds = array<i64: 128, 256>}, {pipeline_mode = #tpu.pipeline_mode<synchronous>, transform_indices = @transform_7, window_bounds = array<i64: 1, 256>}, {transform_indices = @transform_8, window_bounds = array<i64: 1, 2, 256>}]} {
    %c0_i32 = arith.constant 0 : i32
    %0 = arith.cmpi eq, %arg1, %c0_i32 : i32
    %1 = arith.extui %0 : i1 to i32
    %c0_i32_0 = arith.constant 0 : i32
    %2 = arith.cmpi ne, %1, %c0_i32_0 : i32
    scf.if %2 {
      %cst_44 = arith.constant 0.000000e+00 : f32
      %101 = vector.broadcast %cst_44 : f32 to vector<2x64x256xf32>
      %c0_45 = arith.constant 0 : index
      %c0_46 = arith.constant 0 : index
      %c0_47 = arith.constant 0 : index
      %102 = vector.load %arg11[%c0_45, %c0_46, %c0_47] : memref<2x64x256xf32, #tpu.memory_space<vmem>>, vector<2x64x256xf32>
      tpu.vector_store %arg11[%c0_45, %c0_46, %c0_47], %101 {strides = array<i32>} : memref<2x64x256xf32, #tpu.memory_space<vmem>>, vector<2x64x256xf32>,
    } else {
    }
    %c0 = arith.constant 0 : index
    %c0_1 = arith.constant 0 : index
    %c0_2 = arith.constant 0 : index
    %3 = vector.load %arg3[%c0, %c0_1, %c0_2] : memref<2x3x128xf32, #tpu.memory_space<vmem>>, vector<2x3x128xf32>
    %4 = vector.extract_strided_slice %3 {offsets = [0, 0, 0], sizes = [2, 1, 128], strides = [1, 1, 1]} : vector<2x3x128xf32> to vector<2x1x128xf32>
    %5 = vector.shape_cast %4 : vector<2x1x128xf32> to vector<2x128xf32>
    %cst = arith.constant 0.000000e+00 : f32
    %6 = vector.broadcast %cst : f32 to vector<2x128xf32>
    %7 = arith.subf %5, %6 : vector<2x128xf32>
    %cst_3 = arith.constant 2.500000e-01 : f32
    %8 = vector.broadcast %cst_3 : f32 to vector<2x128xf32>
    %9 = arith.divf %7, %8 : vector<2x128xf32>
    %10 = math.floor %9 : vector<2x128xf32>
    %11 = arith.fptosi %10 : vector<2x128xf32> to vector<2x128xi32>
    %12 = vector.extract_strided_slice %3 {offsets = [0, 1, 0], sizes = [2, 1, 128], strides = [1, 1, 1]} : vector<2x3x128xf32> to vector<2x1x128xf32>
    %13 = vector.shape_cast %12 : vector<2x1x128xf32> to vector<2x128xf32>
    %cst_4 = arith.constant 0.000000e+00 : f32
    %14 = vector.broadcast %cst_4 : f32 to vector<2x128xf32>
    %15 = arith.subf %13, %14 : vector<2x128xf32>
    %cst_5 = arith.constant 2.500000e-01 : f32
    %16 = vector.broadcast %cst_5 : f32 to vector<2x128xf32>
    %17 = arith.divf %15, %16 : vector<2x128xf32>
    %18 = math.floor %17 : vector<2x128xf32>
    %19 = arith.fptosi %18 : vector<2x128xf32> to vector<2x128xi32>
    %20 = vector.extract_strided_slice %3 {offsets = [0, 2, 0], sizes = [2, 1, 128], strides = [1, 1, 1]} : vector<2x3x128xf32> to vector<2x1x128xf32>
    %21 = vector.shape_cast %20 : vector<2x1x128xf32> to vector<2x128xf32>
    %cst_6 = arith.constant 0.000000e+00 : f32
    %22 = vector.broadcast %cst_6 : f32 to vector<2x128xf32>
    %23 = arith.subf %21, %22 : vector<2x128xf32>
    %cst_7 = arith.constant 2.500000e-01 : f32
    %24 = vector.broadcast %cst_7 : f32 to vector<2x128xf32>
    %25 = arith.divf %23, %24 : vector<2x128xf32>
    %26 = math.floor %25 : vector<2x128xf32>
    %27 = arith.fptosi %26 : vector<2x128xf32> to vector<2x128xi32>
    %c16_i32 = arith.constant 16 : i32
    %28 = vector.broadcast %c16_i32 : i32 to vector<2x128xi32>
    %29 = arith.muli %11, %28 : vector<2x128xi32>
    %c4_i32 = arith.constant 4 : i32
    %30 = vector.broadcast %c4_i32 : i32 to vector<2x128xi32>
    %31 = arith.muli %19, %30 : vector<2x128xi32>
    %32 = arith.addi %29, %31 : vector<2x128xi32>
    %33 = arith.addi %32, %27 : vector<2x128xi32>
    %c0_i32_8 = arith.constant 0 : i32
    %34 = vector.broadcast %c0_i32_8 : i32 to vector<2x128xi32>
    %35 = arith.cmpi sge, %33, %34 : vector<2x128xi32>
    %c64_i32 = arith.constant 64 : i32
    %36 = vector.broadcast %c64_i32 : i32 to vector<2x128xi32>
    %37 = arith.cmpi slt, %33, %36 : vector<2x128xi32>
    %38 = arith.andi %35, %37 : vector<2x128xi1>
    %c-1_i32 = arith.constant -1 : i32
    %39 = vector.broadcast %c-1_i32 : i32 to vector<2x128xi32>
    %40 = arith.select %38, %33, %39 : vector<2x128xi1>, vector<2x128xi32>
    %c0_9 = arith.constant 0 : index
    %c0_10 = arith.constant 0 : index
    %c0_11 = arith.constant 0 : index
    %41 = vector.load %arg2[%c0_9, %c0_10, %c0_11] : memref<2x128x4xf32, #tpu.memory_space<vmem>>, vector<2x128x4xf32>
    %42 = vector.shape_cast %41 : vector<2x128x4xf32> to vector<256x4xf32>
    %43 = arith.truncf %42 : vector<256x4xf32> to vector<256x4xbf16>
    %c0_12 = arith.constant 0 : index
    %c0_13 = arith.constant 0 : index
    %44 = vector.load %arg4[%c0_12, %c0_13] : memref<4x64xbf16, #tpu.memory_space<vmem>>, vector<4x64xbf16>
    %cst_14 = arith.constant dense<0.000000e+00> : vector<256x64xf32>
    %45 = tpu.matmul %43, %44, %cst_14 {dimension_numbers = #tpu.dot_dimension_numbers<[1], [0], [0], [1], [0, 0, 1, 1], [], []>} : vector<256x4xbf16>, vector<4x64xbf16>, vector<256x64xf32> -> vector<256x64xf32>
    %c0_15 = arith.constant 0 : index
    %c0_16 = arith.constant 0 : index
    %46 = vector.load %arg5[%c0_15, %c0_16] : memref<1x64xf32, #tpu.memory_space<vmem>>, vector<1x64xf32>
    %47 = vector.broadcast %46 : vector<1x64xf32> to vector<256x64xf32>
    %48 = arith.addf %45, %47 : vector<256x64xf32>
    %cst_17 = arith.constant 0.000000e+00 : f32
    %49 = vector.broadcast %cst_17 : f32 to vector<256x64xf32>
    %50 = arith.maximumf %48, %49 : vector<256x64xf32>
    %51 = arith.truncf %50 : vector<256x64xf32> to vector<256x64xbf16>
    %c0_18 = arith.constant 0 : index
    %c0_19 = arith.constant 0 : index
    %52 = vector.load %arg6[%c0_18, %c0_19] : memref<64x128xbf16, #tpu.memory_space<vmem>>, vector<64x128xbf16>
    %cst_20 = arith.constant dense<0.000000e+00> : vector<256x128xf32>
    %53 = tpu.matmul %51, %52, %cst_20 {dimension_numbers = #tpu.dot_dimension_numbers<[1], [0], [0], [1], [0, 0, 1, 1], [], []>} : vector<256x64xbf16>, vector<64x128xbf16>, vector<256x128xf32> -> vector<256x128xf32>
    %c0_21 = arith.constant 0 : index
    %c0_22 = arith.constant 0 : index
    %54 = vector.load %arg7[%c0_21, %c0_22] : memref<1x128xf32, #tpu.memory_space<vmem>>, vector<1x128xf32>
    %55 = vector.broadcast %54 : vector<1x128xf32> to vector<256x128xf32>
    %56 = arith.addf %53, %55 : vector<256x128xf32>
    %cst_23 = arith.constant 0.000000e+00 : f32
    %57 = vector.broadcast %cst_23 : f32 to vector<256x128xf32>
    %58 = arith.maximumf %56, %57 : vector<256x128xf32>
    %59 = arith.truncf %58 : vector<256x128xf32> to vector<256x128xbf16>
    %c0_24 = arith.constant 0 : index
    %c0_25 = arith.constant 0 : index
    %60 = vector.load %arg8[%c0_24, %c0_25] : memref<128x256xbf16, #tpu.memory_space<vmem>>, vector<128x256xbf16>
    %cst_26 = arith.constant dense<0.000000e+00> : vector<256x256xf32>
    %61 = tpu.matmul %59, %60, %cst_26 {dimension_numbers = #tpu.dot_dimension_numbers<[1], [0], [0], [1], [0, 0, 1, 1], [], []>} : vector<256x128xbf16>, vector<128x256xbf16>, vector<256x256xf32> -> vector<256x256xf32>
    %c0_27 = arith.constant 0 : index
    %c0_28 = arith.constant 0 : index
    %62 = vector.load %arg9[%c0_27, %c0_28] : memref<1x256xf32, #tpu.memory_space<vmem>>, vector<1x256xf32>
    %63 = vector.broadcast %62 : vector<1x256xf32> to vector<256x256xf32>
    %64 = arith.addf %61, %63 : vector<256x256xf32>
    %cst_29 = arith.constant 0.000000e+00 : f32
    %65 = vector.broadcast %cst_29 : f32 to vector<256x256xf32>
    %66 = arith.maximumf %64, %65 : vector<256x256xf32>
    %67 = tpu.iota {dimensions = array<i32: 0>} : vector<64x128xi32>
    %68 = vector.extract_strided_slice %40 {offsets = [0, 0], sizes = [1, 128], strides = [1, 1]} : vector<2x128xi32> to vector<1x128xi32>
    %69 = vector.broadcast %68 : vector<1x128xi32> to vector<64x128xi32>
    %70 = arith.cmpi eq, %67, %69 : vector<64x128xi32>
    %71 = arith.extui %70 : vector<64x128xi1> to vector<64x128xi32>
    %72 = arith.sitofp %71 : vector<64x128xi32> to vector<64x128xf32>
    %73 = arith.truncf %72 : vector<64x128xf32> to vector<64x128xbf16>
    %74 = vector.extract_strided_slice %66 {offsets = [0, 0], sizes = [128, 256], strides = [1, 1]} : vector<256x256xf32> to vector<128x256xf32>
    %75 = arith.truncf %74 : vector<128x256xf32> to vector<128x256xbf16>
    %c0_30 = arith.constant 0 : index
    %c0_31 = arith.constant 0 : index
    %c0_32 = arith.constant 0 : index
    %76 = vector.load %arg11[%c0_30, %c0_31, %c0_32] : memref<2x64x256xf32, #tpu.memory_space<vmem>>, vector<1x64x256xf32>
    %77 = vector.shape_cast %76 : vector<1x64x256xf32> to vector<64x256xf32>
    %cst_33 = arith.constant dense<0.000000e+00> : vector<64x256xf32>
    %78 = tpu.matmul %73, %75, %cst_33 {dimension_numbers = #tpu.dot_dimension_numbers<[1], [0], [0], [1], [0, 0, 1, 1], [], []>} : vector<64x128xbf16>, vector<128x256xbf16>, vector<64x256xf32> -> vector<64x256xf32>
    %79 = arith.addf %77, %78 : vector<64x256xf32>
    %c0_34 = arith.constant 0 : index
    %c0_35 = arith.constant 0 : index
    %c0_36 = arith.constant 0 : index
    %80 = vector.load %arg11[%c0_34, %c0_35, %c0_36] : memref<2x64x256xf32, #tpu.memory_space<vmem>>, vector<1x64x256xf32>
    %81 = vector.shape_cast %80 : vector<1x64x256xf32> to vector<64x256xf32>
    %82 = vector.shape_cast %79 : vector<64x256xf32> to vector<1x64x256xf32>
    tpu.vector_store %arg11[%c0_34, %c0_35, %c0_36], %82 {strides = array<i32>} : memref<2x64x256xf32, #tpu.memory_space<vmem>>, vector<1x64x256xf32>,
    %83 = vector.extract_strided_slice %40 {offsets = [1, 0], sizes = [1, 128], strides = [1, 1]} : vector<2x128xi32> to vector<1x128xi32>
    %84 = vector.broadcast %83 : vector<1x128xi32> to vector<64x128xi32>
    %85 = arith.cmpi eq, %67, %84 : vector<64x128xi32>
    %86 = arith.extui %85 : vector<64x128xi1> to vector<64x128xi32>
    %87 = arith.sitofp %86 : vector<64x128xi32> to vector<64x128xf32>
    %88 = arith.truncf %87 : vector<64x128xf32> to vector<64x128xbf16>
    %89 = vector.extract_strided_slice %66 {offsets = [128, 0], sizes = [128, 256], strides = [1, 1]} : vector<256x256xf32> to vector<128x256xf32>
    %90 = arith.truncf %89 : vector<128x256xf32> to vector<128x256xbf16>
    %c1 = arith.constant 1 : index
    %c0_37 = arith.constant 0 : index
    %c0_38 = arith.constant 0 : index
    %91 = vector.load %arg11[%c1, %c0_37, %c0_38] : memref<2x64x256xf32, #tpu.memory_space<vmem>>, vector<1x64x256xf32>
    %92 = vector.shape_cast %91 : vector<1x64x256xf32> to vector<64x256xf32>
    %cst_39 = arith.constant dense<0.000000e+00> : vector<64x256xf32>
    %93 = tpu.matmul %88, %90, %cst_39 {dimension_numbers = #tpu.dot_dimension_numbers<[1], [0], [0], [1], [0, 0, 1, 1], [], []>} : vector<64x128xbf16>, vector<128x256xbf16>, vector<64x256xf32> -> vector<64x256xf32>
    %94 = arith.addf %92, %93 : vector<64x256xf32>
    %c1_40 = arith.constant 1 : index
    %c0_41 = arith.constant 0 : index
    %c0_42 = arith.constant 0 : index
    %95 = vector.load %arg11[%c1_40, %c0_41, %c0_42] : memref<2x64x256xf32, #tpu.memory_space<vmem>>, vector<1x64x256xf32>
    %96 = vector.shape_cast %95 : vector<1x64x256xf32> to vector<64x256xf32>
    %97 = vector.shape_cast %94 : vector<64x256xf32> to vector<1x64x256xf32>
    tpu.vector_store %arg11[%c1_40, %c0_41, %c0_42], %97 {strides = array<i32>} : memref<2x64x256xf32, #tpu.memory_space<vmem>>, vector<1x64x256xf32>,
    %c1_i32 = arith.constant 1 : i32
    %98 = arith.cmpi eq, %arg1, %c1_i32 : i32
    %99 = arith.extui %98 : i1 to i32
    %c0_i32_43 = arith.constant 0 : i32
    %100 = arith.cmpi ne, %99, %c0_i32_43 : i32
    scf.if %100 {
      %c0_44 = arith.constant 0 : index
      %c0_45 = arith.constant 0 : index
      %c0_46 = arith.constant 0 : index
      %101 = vector.load %arg11[%c0_44, %c0_45, %c0_46] : memref<2x64x256xf32, #tpu.memory_space<vmem>>, vector<2x64x256xf32>
      %cst_47 = arith.constant dense<0xFF800000> : vector<2x256xf32>
      %102 = vector.multi_reduction <maximumf>, %101, %cst_47 [1] : vector<2x64x256xf32> to vector<2x256xf32>
      %103 = vector.shape_cast %102 : vector<2x256xf32> to vector<1x2x256xf32>
      %c0_48 = arith.constant 0 : index
      %c0_49 = arith.constant 0 : index
      %c0_50 = arith.constant 0 : index
      %104 = vector.load %arg10[%c0_48, %c0_49, %c0_50] : memref<1x2x256xf32, #tpu.memory_space<vmem>>, vector<1x2x256xf32>
      tpu.vector_store %arg10[%c0_48, %c0_49, %c0_50], %103 {strides = array<i32>} : memref<1x2x256xf32, #tpu.memory_space<vmem>>, vector<1x2x256xf32>,
    } else {
    }
    return
  }
  func.func @transform_0(%arg0: i32, %arg1: i32) -> (i32, i32, i32) {
    %c0_i32 = arith.constant 0 : i32
    %c0_i32_0 = arith.constant 0 : i32
    return %arg0, %arg1, %c0_i32 : i32, i32, i32
  }
  func.func @transform_1(%arg0: i32, %arg1: i32) -> (i32, i32, i32) {
    %c0_i32 = arith.constant 0 : i32
    %c0_i32_0 = arith.constant 0 : i32
    return %arg0, %c0_i32, %arg1 : i32, i32, i32
  }
  func.func @transform_2(%arg0: i32, %arg1: i32) -> (i32, i32) {
    %c0_i32 = arith.constant 0 : i32
    %c0_i32_0 = arith.constant 0 : i32
    %c0_i32_1 = arith.constant 0 : i32
    return %c0_i32, %c0_i32_0 : i32, i32
  }
  func.func @transform_3(%arg0: i32, %arg1: i32) -> (i32, i32) {
    %c0_i32 = arith.constant 0 : i32
    %c0_i32_0 = arith.constant 0 : i32
    %c0_i32_1 = arith.constant 0 : i32
    return %c0_i32, %c0_i32_0 : i32, i32
  }
  func.func @transform_4(%arg0: i32, %arg1: i32) -> (i32, i32) {
    %c0_i32 = arith.constant 0 : i32
    %c0_i32_0 = arith.constant 0 : i32
    %c0_i32_1 = arith.constant 0 : i32
    return %c0_i32, %c0_i32_0 : i32, i32
  }
  func.func @transform_5(%arg0: i32, %arg1: i32) -> (i32, i32) {
    %c0_i32 = arith.constant 0 : i32
    %c0_i32_0 = arith.constant 0 : i32
    %c0_i32_1 = arith.constant 0 : i32
    return %c0_i32, %c0_i32_0 : i32, i32
  }
  func.func @transform_6(%arg0: i32, %arg1: i32) -> (i32, i32) {
    %c0_i32 = arith.constant 0 : i32
    %c0_i32_0 = arith.constant 0 : i32
    %c0_i32_1 = arith.constant 0 : i32
    return %c0_i32, %c0_i32_0 : i32, i32
  }
  func.func @transform_7(%arg0: i32, %arg1: i32) -> (i32, i32) {
    %c0_i32 = arith.constant 0 : i32
    %c0_i32_0 = arith.constant 0 : i32
    %c0_i32_1 = arith.constant 0 : i32
    return %c0_i32, %c0_i32_0 : i32, i32
  }
  func.func @transform_8(%arg0: i32, %arg1: i32) -> (i32, i32, i32) {
    %c0_i32 = arith.constant 0 : i32
    %c0_i32_0 = arith.constant 0 : i32
    %c0_i32_1 = arith.constant 0 : i32
    return %arg0, %c0_i32, %c0_i32_0 : i32, i32, i32
  }
}

</mosaic_0001>

<bundles_post_ra>
// kernel: tpu_custom_call.1
= control target key start
LH: loop header
LB: loop body
LE: loop exit
PB: predicated region body
PF: predicated region fallthrough
CT: control target
= control target key end

     0   :  { %s3131_s0 = inlined_call_operand.vmem [shape: f32[4,256,4], index: 0, kind: input, shape index: {}]   ;;  %s3132_s1 = inlined_call_operand.vmem [shape: f32[4,3,256], index: 1, kind: input, shape index: {}]   ;;  %s3133_s2 = inlined_call_operand.vmem [shape: bf16[4,64], index: 2, kind: input, shape index: {}]   ;;  %s3134_s3 = inlined_call_operand.vmem [shape: f32[1,64], index: 3, kind: input, shape index: {}]   ;;  %s3135_s4 = inlined_call_operand.vmem [shape: bf16[64,128], index: 4, kind: input, shape index: {}]   ;;  %s3136_s5 = inlined_call_operand.vmem [shape: f32[1,128], index: 5, kind: input, shape index: {}]   ;;  %s3137_s6 = inlined_call_operand.vmem [shape: bf16[128,256], index: 6, kind: input, shape index: {}]   ;;  %s3138_s7 = inlined_call_operand.vmem [shape: f32[1,256], index: 7, kind: input, shape index: {}]   ;;  %s3139_s8 = inlined_call_operand.hbm [shape: f32[2,2,256], index: 8, kind: output, shape index: {}]  }
   0x1   :  { %3145 = sst [smem:[#allocation12_spill]] %s3131_s0 }
   0x2   :  { %3146 = sst [smem:[#allocation13_spill]] %s3132_s1 }
   0x3   :  { %13 = vsyncpa [#allocation6], 0 }
   0x4   :  { %15 = vsyncpa [#allocation6 + $0x1], 0  ;;  %s2441_s27 = smov 0   ;;  %s2443_s28 = smov 0  }
   0x5   :  { %s2445_s29 = smov 0   ;;  %s2447_s30 = smov 0  }
   0x6   :  { %s2449_s9 = smov 0   ;;  %s2451_s10 = smov 0  }
   0x7   :  { %s2453_s11 = smov 0   ;;  %s2455_s12 = smov 0  }
   0x8   :  { %s2457_s13 = smov 0   ;;  %s2459_s14 = smov 0  }
   0x9 LB: > { %3147 = sst [smem:[#allocation8_spill]] %s2355_s27  ;;  %s1976_s15 = sadd.s32 4294967295, %s2391_s14   ;;  %s2391_s14 = sphi %s2459_s14, %s21_s14   ;;  %s2387_s13 = sphi %s2457_s13, %s3171_s13   ;;  %s2383_s12 = sphi %s2455_s12, %s3170_s12   ;;  %s2379_s11 = sphi %s2453_s11, %s3169_s11   ;;  %s2375_s10 = sphi %s2451_s10, %s3168_s10   ;;  %s2371_s9 = sphi %s2449_s9, %s3167_s9   ;;  %s2367_s30 = sphi %s2447_s30, %s3166_s30   ;;  %s2363_s29 = sphi %s2445_s29, %s3165_s29   ;;  %s2359_s28 = sphi %s2443_s28, %s3164_s28   ;;  %s2355_s27 = sphi %s2441_s27, %s3163_s27  }
   0xa   : > { %s1977_s16 = sadd.s32 4294967294, %s2391_s14   ;;  %s30_s17 = sadd.s32 1, %s2383_s12 }
   0xb   : > { %s33_s18 = sadd.s32 1, %s2387_s13  ;;  %p31_p0 = scmp.ge.s32.totalorder %s30_s17, 2 }
   0xc   : > { %s42_s19 = sadd.s32 1, %s2371_s9  ;;  %p49_p1 = scmp.ne.s32.totalorder %s2371_s9, %s2367_s30 }
   0xd   : > { %p50_p2 = scmp.eq.s32.totalorder %s2391_s14, 0  ;;  %s3173_s17 = smov (%p31_p0, %s30_s17), 0 }
   0xe   : > { %3148 = sst [smem:[#allocation9_spill]] %s3173_s17  ;;  %s3175_s18 = smov (!%p31_p0, %s33_s18), %s2387_s13 }
   0xf   : > { %s38_s20 = ssub.s32 %s2383_s12, %s3173_s17  ;;  %p2504_p3 = por %p50_p2, %p49_p1 }
  0x10   : > { %p35_p4 = scmp.ge.s32.totalorder %s3175_s18, 2  ;;  %s222_s22 = sadd.s32 1, %s2363_s29 }
  0x11   : > { %p232_p5 = scmp.ne.s32.totalorder %s2363_s29, %s2359_s28  ;;  %p233_p6 = scmp.eq.s32.totalorder %s1976_s15, 3 }
  0x12   : > { %s3177_s18 = smov (%p35_p4, %s3175_s18), 0  ;;  %p238_p8 = scmp.ne.s32.totalorder %s2359_s28, %s2355_s27 }
  0x13   : > { %3150 = sst [smem:[#allocation10_spill]] %s3177_s18  ;;  %p2513_p7 = por %p233_p6, %p232_p5 }
  0x14   : > { %s37_s24 = ssub.s32 %s2387_s13, %s3177_s18  ;;  %p239_p9 = scmp.eq.s32.totalorder %s1977_s16, 3 }
  0x15   : > { %s39_s25 = sor.u32 %s38_s20, %s37_s24  ;;  %p220_p10 = scmp.eq.s32.totalorder %s37_s24, 0 }
  0x16   : > { %p40_p11 = scmp.eq.s32.totalorder %s39_s25, 0  ;;  %p2521_p12 = por %p239_p9, %p238_p8 }
  0x17   : > { %s2526_s17 = scalar_select %p220_p10, %s2363_s29, %s222_s22  }
  0x18   : > { %s3152_s26 = scalar_select %p2521_p12, 1, 0 }
  0x19   : > { %s2529_s15 = scalar_select %p40_p11, %s2371_s9, %s42_s19  }
  0x1a   : > { %3153 = sst [smem:[#allocation11_spill]] %s3152_s26  ;;  %p1979_p13 = scmp.ge.s32.totalorder %s2391_s14, 4 }
  0x1c   : > { %273 = sbr.rel (%p1979_p13) target bundleno = 87 (0x57), region = 40 }
  0x21   : > { %276 = sbr.rel (!%p2504_p3) target bundleno = 75 (0x4b), region = 44  ;;  %s278_s16 = sand.u32 (%p2504_p3), 1, %s2371_s9  }
  0x22   : > { %s1982_s20 = sshll.u32 (%p2504_p3), %s2383_s12, 4  ;;  %s1980_s24 = sshll.u32 (%p2504_p3), %s278_s16, 8 }
  0x23   : > { %s2160_s25 = sshll.u32 (%p2504_p3), %s2387_s13, 6  ;;  %s3154_s0 = sld [smem:[#allocation12_spill]] (%p2504_p3) }
  0x24   : > { %s284_s18 = sadd.s32 (%p2504_p3), %s2160_s25, %s1982_s20  ;;  %s2545_s16 = scalar_lea.vmem (%p2504_p3), [#allocation3], %s1980_s24 }
  0x25   : > { %s1984_s27 = sshll.u32 (%p2504_p3), %s284_s18, 3 }
  0x29   : > { %s2540_s19 = scalar_lea.vmem %s3154_s0, %s1984_s27 }
  0x2a   : > { %v377_v0 = vld [vmem:[%s2540_s19] sm:$0xff]  ;;  %v379_v1 = vld [vmem:[%s2540_s19 + $0x8] sm:$0xff]  ;;  %v381_v2 = vld [vmem:[%s2540_s19 + $0x10] sm:$0xff] }
  0x2b   : > { %378 = vst [vmem:[%s2545_s16] sm:$0xff] %v377_v0  ;;  %v383_v3 = vld [vmem:[%s2540_s19 + $0x18] sm:$0xff]  ;;  %v385_v4 = vld [vmem:[%s2540_s19 + $0x20] sm:$0xff]  ;;  %v387_v5 = vld [vmem:[%s2540_s19 + $0x28] sm:$0xff] }
  0x2c   : > { %380 = vst [vmem:[%s2545_s16 + $0x8] sm:$0xff] %v379_v1  ;;  %v389_v6 = vld [vmem:[%s2540_s19 + $0x30] sm:$0xff]  ;;  %v391_v7 = vld [vmem:[%s2540_s19 + $0x38] sm:$0xff]  ;;  %v393_v8 = vld [vmem:[%s2540_s19 + $0x40] sm:$0xff] }
  0x2d   : > { %382 = vst [vmem:[%s2545_s16 + $0x10] sm:$0xff] %v381_v2  ;;  %v395_v9 = vld [vmem:[%s2540_s19 + $0x48] sm:$0xff]  ;;  %v397_v10 = vld [vmem:[%s2540_s19 + $0x50] sm:$0xff]  ;;  %v399_v11 = vld [vmem:[%s2540_s19 + $0x58] sm:$0xff] }
  0x2e   : > { %384 = vst [vmem:[%s2545_s16 + $0x18] sm:$0xff] %v383_v3  ;;  %v401_v12 = vld [vmem:[%s2540_s19 + $0x60] sm:$0xff]  ;;  %v403_v13 = vld [vmem:[%s2540_s19 + $0x68] sm:$0xff]  ;;  %v405_v14 = vld [vmem:[%s2540_s19 + $0x70] sm:$0xff] }
  0x2f   : > { %386 = vst [vmem:[%s2545_s16 + $0x20] sm:$0xff] %v385_v4  ;;  %v407_v15 = vld [vmem:[%s2540_s19 + $0x78] sm:$0xff]  ;;  %v409_v16 = vld [vmem:[%s2540_s19 + $0x100] sm:$0xff]  ;;  %v411_v17 = vld [vmem:[%s2540_s19 + $0x108] sm:$0xff] }
  0x30   : > { %388 = vst [vmem:[%s2545_s16 + $0x28] sm:$0xff] %v387_v5  ;;  %v413_v18 = vld [vmem:[%s2540_s19 + $0x110] sm:$0xff]  ;;  %v415_v19 = vld [vmem:[%s2540_s19 + $0x118] sm:$0xff]  ;;  %v417_v20 = vld [vmem:[%s2540_s19 + $0x120] sm:$0xff] }
  0x31   : > { %390 = vst [vmem:[%s2545_s16 + $0x30] sm:$0xff] %v389_v6  ;;  %v419_v21 = vld [vmem:[%s2540_s19 + $0x128] sm:$0xff]  ;;  %v421_v22 = vld [vmem:[%s2540_s19 + $0x130] sm:$0xff]  ;;  %v423_v23 = vld [vmem:[%s2540_s19 + $0x138] sm:$0xff] }
  0x32   : > { %392 = vst [vmem:[%s2545_s16 + $0x38] sm:$0xff] %v391_v7  ;;  %v425_v24 = vld [vmem:[%s2540_s19 + $0x140] sm:$0xff]  ;;  %v427_v25 = vld [vmem:[%s2540_s19 + $0x148] sm:$0xff]  ;;  %v429_v26 = vld [vmem:[%s2540_s19 + $0x150] sm:$0xff] }
  0x33   : > { %394 = vst [vmem:[%s2545_s16 + $0x40] sm:$0xff] %v393_v8  ;;  %v431_v27 = vld [vmem:[%s2540_s19 + $0x158] sm:$0xff]  ;;  %v433_v28 = vld [vmem:[%s2540_s19 + $0x160] sm:$0xff]  ;;  %v435_v29 = vld [vmem:[%s2540_s19 + $0x168] sm:$0xff] }
  0x34   : > { %396 = vst [vmem:[%s2545_s16 + $0x48] sm:$0xff] %v395_v9  ;;  %v437_v30 = vld [vmem:[%s2540_s19 + $0x170] sm:$0xff]  ;;  %v439_v31 = vld [vmem:[%s2540_s19 + $0x178] sm:$0xff] }
  0x35   : > { %398 = vst [vmem:[%s2545_s16 + $0x50] sm:$0xff] %v397_v10 }
  0x36   : > { %400 = vst [vmem:[%s2545_s16 + $0x58] sm:$0xff] %v399_v11 }
  0x37   : > { %402 = vst [vmem:[%s2545_s16 + $0x60] sm:$0xff] %v401_v12 }
  0x38   : > { %404 = vst [vmem:[%s2545_s16 + $0x68] sm:$0xff] %v403_v13 }
  0x39   : > { %406 = vst [vmem:[%s2545_s16 + $0x70] sm:$0xff] %v405_v14 }
  0x3a   : > { %408 = vst [vmem:[%s2545_s16 + $0x78] sm:$0xff] %v407_v15 }
  0x3b   : > { %410 = vst [vmem:[%s2545_s16 + $0x80] sm:$0xff] %v409_v16 }
  0x3c   : > { %412 = vst [vmem:[%s2545_s16 + $0x88] sm:$0xff] %v411_v17 }
  0x3d   : > { %414 = vst [vmem:[%s2545_s16 + $0x90] sm:$0xff] %v413_v18 }
  0x3e   : > { %416 = vst [vmem:[%s2545_s16 + $0x98] sm:$0xff] %v415_v19 }
  0x3f   : > { %418 = vst [vmem:[%s2545_s16 + $0xa0] sm:$0xff] %v417_v20 }
  0x40   : > { %420 = vst [vmem:[%s2545_s16 + $0xa8] sm:$0xff] %v419_v21 }
  0x41   : > { %422 = vst [vmem:[%s2545_s16 + $0xb0] sm:$0xff] %v421_v22 }
  0x42   : > { %424 = vst [vmem:[%s2545_s16 + $0xb8] sm:$0xff] %v423_v23 }
  0x43   : > { %426 = vst [vmem:[%s2545_s16 + $0xc0] sm:$0xff] %v425_v24 }
  0x44   : > { %428 = vst [vmem:[%s2545_s16 + $0xc8] sm:$0xff] %v427_v25 }
  0x45   : > { %430 = vst [vmem:[%s2545_s16 + $0xd0] sm:$0xff] %v429_v26 }
  0x46   : > { %432 = vst [vmem:[%s2545_s16 + $0xd8] sm:$0xff] %v431_v27 }
  0x47   : > { %434 = vst [vmem:[%s2545_s16 + $0xe0] sm:$0xff] %v433_v28 }
  0x48   : > { %436 = vst [vmem:[%s2545_s16 + $0xe8] sm:$0xff] %v435_v29 }
  0x49   : > { %438 = vst [vmem:[%s2545_s16 + $0xf0] sm:$0xff] %v437_v30 }
  0x4a   : > { %440 = vst [vmem:[%s2545_s16 + $0xf8] sm:$0xff] %v439_v31 }
  0x4b PF: > { %446 = sbr.rel (!%p2504_p3) target bundleno = 87 (0x57), region = 82  ;;  %s448_s27 = sand.u32 (%p2504_p3), 1, %s2371_s9  }
  0x4c   : > { %s2161_s18 = sshll.u32 (%p2504_p3), %s2387_s13, 2  ;;  %s1985_s26 = sshll.u32 (%p2504_p3), %s448_s27, 3 }
  0x4d   : > { %s453_s20 = sadd.s32 (%p2504_p3), %s2383_s12, %s2161_s18  ;;  %s3155_s1 = sld [smem:[#allocation13_spill]] (%p2504_p3) }
  0x4e   : > { %s1988_s24 = sshll.u32 (%p2504_p3), %s453_s20, 2  ;;  %s450_s19 = scalar_lea.vmem (%p2504_p3), [#allocation4], %s1985_s26 }
  0x53   : > { %s455_s0 = scalar_lea.vmem %s3155_s1, %s1988_s24 }
  0x54   : > { %v472_v32 = vld [vmem:[%s455_s0] sm:$0xf]  ;;  %v474_v33 = vld [vmem:[%s455_s0 + $0x8] sm:$0xf] }
  0x55   : > { %473 = vst [vmem:[%s450_s19] sm:$0xf] %v472_v32 }
  0x56   : > { %475 = vst [vmem:[%s450_s19 + $0x4] sm:$0xf] %v474_v33 }
  0x57 PF: > { %p1989_p0 = scmp.ge.s32.totalorder %s2391_s14, 1  ;;  %p502_p1 = scmp.lt.s32.totalorder %s2391_s14, 5 }
  0x59   : > { %p503_p2 = pnand %p1989_p0, %p502_p1 }
  0x5a   : > { %s509_s21 = sand.u32 (!%p503_p2), 1, %s2367_s30   ;;  %s3144_s16 = sand.u32 (!%p503_p2), 1, %s2359_s28  }
  0x5b   : > { %506 = sbr.rel (%p503_p2) target bundleno = 1085 (0x43d), region = 123  ;;  %s1990_s27 = sshll.u32 (!%p503_p2), %s509_s21, 8 }
  0x5c   : > { %s2620_s18 = sshll.u32 (!%p503_p2), %s509_s21, 3  ;;  %s2624_s0 = sshll.u32 (!%p503_p2), %s3144_s16, 2 }
  0x5d   : > { %s2626_s26 = scalar_lea.vmem (!%p503_p2), [#allocation3], %s1990_s27  ;;  %s518_s20 = scalar_lea.vmem (!%p503_p2), [#allocation4], %s2620_s18 }
  0x5e   : > { %p1993_p3 = scmp.ne.s32.totalorder (!%p503_p2), %s2375_s10, 0 }
  0x60   : > { %560 = sbr.rel (%p1993_p3) target bundleno = 134 (0x86), region = 135 }
  0x65   : > { %v2393_v34 = vmov 0.0  }
  0x66   : > { %561 = vst [vmem:[#allocation2 + $0xb0] sm:$0xff] %v2393_v34 }
  0x67   : > { %562 = vst [vmem:[#allocation2] sm:$0xff] %v2393_v34 }
  0x68   : > { %563 = vst [vmem:[#allocation2 + $0xd8] sm:$0xff] %v2393_v34 }
  0x69   : > { %564 = vst [vmem:[#allocation2 + $0x18] sm:$0xff] %v2393_v34 }
  0x6a   : > { %565 = vst [vmem:[#allocation2 + $0x50] sm:$0xff] %v2393_v34 }
  0x6b   : > { %566 = vst [vmem:[#allocation2 + $0x68] sm:$0xff] %v2393_v34 }
  0x6c   : > { %567 = vst [vmem:[#allocation2 + $0x30] sm:$0xff] %v2393_v34 }
  0x6d   : > { %568 = vst [vmem:[#allocation2 + $0x48] sm:$0xff] %v2393_v34 }
  0x6e   : > { %569 = vst [vmem:[#allocation2 + $0x80] sm:$0xff] %v2393_v34 }
  0x6f   : > { %570 = vst [vmem:[#allocation2 + $0x88] sm:$0xff] %v2393_v34 }
  0x70   : > { %571 = vst [vmem:[#allocation2 + $0xe8] sm:$0xff] %v2393_v34 }
  0x71   : > { %572 = vst [vmem:[#allocation2 + $0xb8] sm:$0xff] %v2393_v34 }
  0x72   : > { %573 = vst [vmem:[#allocation2 + $0x60] sm:$0xff] %v2393_v34 }
  0x73   : > { %574 = vst [vmem:[#allocation2 + $0xf0] sm:$0xff] %v2393_v34 }
  0x74   : > { %575 = vst [vmem:[#allocation2 + $0x8] sm:$0xff] %v2393_v34 }
  0x75   : > { %576 = vst [vmem:[#allocation2 + $0x78] sm:$0xff] %v2393_v34 }
  0x76   : > { %577 = vst [vmem:[#allocation2 + $0x38] sm:$0xff] %v2393_v34 }
  0x77   : > { %578 = vst [vmem:[#allocation2 + $0x58] sm:$0xff] %v2393_v34 }
  0x78   : > { %579 = vst [vmem:[#allocation2 + $0x40] sm:$0xff] %v2393_v34 }
  0x79   : > { %580 = vst [vmem:[#allocation2 + $0xc8] sm:$0xff] %v2393_v34 }
  0x7a   : > { %581 = vst [vmem:[#allocation2 + $0xe0] sm:$0xff] %v2393_v34 }
  0x7b   : > { %582 = vst [vmem:[#allocation2 + $0x90] sm:$0xff] %v2393_v34 }
  0x7c   : > { %583 = vst [vmem:[#allocation2 + $0x70] sm:$0xff] %v2393_v34 }
  0x7d   : > { %584 = vst [vmem:[#allocation2 + $0xc0] sm:$0xff] %v2393_v34 }
  0x7e   : > { %585 = vst [vmem:[#allocation2 + $0xa8] sm:$0xff] %v2393_v34 }
  0x7f   : > { %586 = vst [vmem:[#allocation2 + $0xd0] sm:$0xff] %v2393_v34 }
  0x80   : > { %587 = vst [vmem:[#allocation2 + $0x10] sm:$0xff] %v2393_v34 }
  0x81   : > { %588 = vst [vmem:[#allocation2 + $0x28] sm:$0xff] %v2393_v34 }
  0x82   : > { %589 = vst [vmem:[#allocation2 + $0xa0] sm:$0xff] %v2393_v34 }
  0x83   : > { %590 = vst [vmem:[#allocation2 + $0xf8] sm:$0xff] %v2393_v34 }
  0x84   : > { %591 = vst [vmem:[#allocation2 + $0x20] sm:$0xff] %v2393_v34 }
  0x85   : > { %592 = vst [vmem:[#allocation2 + $0x98] sm:$0xff] %v2393_v34 }
  0x86 PF: > { %v676_v35 = vld [vmem:[%s3133_s2] sm:$0x3]  ;;  %vm730_vm0 = vcmask 1041408   ;;  %v629_v37 = vld [vmem:[%s2626_s26 + $0x8] sm:$0xff]  ;;  %vm681_vm1 = vcmask 31744   ;;  %v630_v40 = vld [vmem:[%s2626_s26 + $0x10] sm:$0xff] }
  0x87   : > { %v628_v36 = vld [vmem:[%s2626_s26] sm:$0xff]  ;;  %v732_v38 = vsel %vm730_vm0, %v676_v35, 0  ;;  %v631_v41 = vld [vmem:[%s2626_s26 + $0x18] sm:$0xff]  ;;  %v633_v44 = vld [vmem:[%s2626_s26 + $0x28] sm:$0xff]  ;;  %vm907_vm2 = vcmask 523264   ;;  %p2154_p4 = scmp.ne.s32.totalorder %s2375_s10, 1 }
  0x88   : > { %v660_v39 = vpack.c.bf16 %v629_v37, %v628_v36  ;;  %741 = vmatpush.bf16.msra.mxu0 %v732_v38  ;;  %v661_v42 = vpack.c.bf16 %v631_v41, %v630_v40  ;;  %v632_v43 = vld [vmem:[%s2626_s26 + $0x20] sm:$0xff]  ;;  %v634_v46 = vld [vmem:[%s2626_s26 + $0x30] sm:$0xff]  ;;  %v635_v47 = vld [vmem:[%s2626_s26 + $0x38] sm:$0xff]  ;;  %s3156_s10 = scalar_lea.vmem (!%p2154_p4), [#allocation5], %s2624_s0 }
  0x89   : > { %v662_v45 = vpack.c.bf16 %v633_v44, %v632_v43  ;;  %v663_v48 = vpack.c.bf16 %v635_v47, %v634_v46  ;;  %v636_v49 = vld [vmem:[%s2626_s26 + $0x40] sm:$0xff]  ;;  %v637_v50 = vld [vmem:[%s2626_s26 + $0x48] sm:$0xff]  ;;  %v638_v52 = vld [vmem:[%s2626_s26 + $0x50] sm:$0xff] }
  0x8a   : > { %v664_v51 = vpack.c.bf16 %v637_v50, %v636_v49  ;;  %v639_v53 = vld [vmem:[%s2626_s26 + $0x58] sm:$0xff]  ;;  %v640_v55 = vld [vmem:[%s2626_s26 + $0x60] sm:$0xff]  ;;  %v641_v56 = vld [vmem:[%s2626_s26 + $0x68] sm:$0xff] }
  0x8b   : > { %1994 = vmatmul.msk.bf16.vlgmr.msra.gmra.mxu0 %vm681_vm1, %v660_v39  ;;  %v665_v54 = vpack.c.bf16 %v639_v53, %v638_v52  ;;  %v2165_v57 = vld [vmem:[%s3135_s4 + $0x18] sm:$0xff]  ;;  %v666_v58 = vpack.c.bf16 %v641_v56, %v640_v55  ;;  %v2164_v59 = vld [vmem:[%s3135_s4 + $0x10] sm:$0xff]  ;;  %v2163_v60 = vld [vmem:[%s3135_s4 + $0x8] sm:$0xff] }
  0x8c   : > { %960 = vmatpush.bf16.msra.mxu1 %v2165_v57  ;;  %v2162_v61 = vld [vmem:[%s3135_s4] sm:$0xff]  ;;  %v642_v62 = vld [vmem:[%s2626_s26 + $0x70] sm:$0xff]  ;;  %v643_v63 = vld [vmem:[%s2626_s26 + $0x78] sm:$0xff] }
  0x8d   : > { %v667_v0 = vpack.c.bf16 %v643_v63, %v642_v62  ;;  %v644_v1 = vld [vmem:[%s2626_s26 + $0x80] sm:$0xff]  ;;  %v645_v2 = vld [vmem:[%s2626_s26 + $0x88] sm:$0xff]  ;;  %v646_v11 = vld [vmem:[%s2626_s26 + $0x90] sm:$0xff] }
  0x8e   : > { %v668_v3 = vpack.c.bf16 %v645_v2, %v644_v1  ;;  %v2676_v5 = vld [vmem:[%s3134_s3] ss:$0 sm:$0xff]  ;;  %v647_v12 = vld [vmem:[%s2626_s26 + $0x98] sm:$0xff]  ;;  %v649_v22 = vld [vmem:[%s2626_s26 + $0xa8] sm:$0xff] }
  0x8f   : > { %v669_v14 = vpack.c.bf16 %v647_v12, %v646_v11  ;;  %v648_v21 = vld [vmem:[%s2626_s26 + $0xa0] sm:$0xff]  ;;  %v650_v31 = vld [vmem:[%s2626_s26 + $0xb0] sm:$0xff]  ;;  %v651_v32 = vld [vmem:[%s2626_s26 + $0xb8] sm:$0xff] }
  0x90   : > { %961 = vmatpush.bf16.msra.mxu1 %v2164_v59  ;;  %v670_v24 = vpack.c.bf16 %v649_v22, %v648_v21  ;;  %v671_v34 = vpack.c.bf16 %v651_v32, %v650_v31  ;;  %v652_v41 = vld [vmem:[%s2626_s26 + $0xc0] sm:$0xff]  ;;  %v655_v52 = vld [vmem:[%s2626_s26 + $0xd8] sm:$0xff]  ;;  %v2100_v59 = vld [vmem:[%s3137_s6 + $0x70] sm:$0xf] }
  0x91   : > { %v2102_v63 = vld [vmem:[%s3137_s6 + $0x78] sm:$0xf0]  ;;  %v2094_v11 = vld [vmem:[%s3137_s6 + $0x68] sm:$0xf0]  ;;  %v2076_v21 = vld [vmem:[%s3137_s6 + $0x40] sm:$0xf] }
  0x92   : > { %v2175_v22 = vld [vmem:[%s3137_s6 + $0x44] sm:$0xf0]  ;;  %v2173_v31 = vld [vmem:[%s3137_s6 + $0x34] sm:$0xf0]  ;;  %v2172_v32 = vld [vmem:[%s3137_s6 + $0x34] sm:$0xf] }
  0x94   : > { %962 = vmatpush.bf16.msra.mxu1 %v2163_v60  ;;  %v2181_v60 = vld [vmem:[%s3137_s6 + $0x74] sm:$0xf0] }
  0x95   : > { %v2101_v62 = vor.u32 %v2181_v60, %v2100_v59  ;;  %v2046_v59 = vld [vmem:[%s3137_s6 + $0x8] sm:$0xf0] }
  0x97   : > { %1195 = vmatpush.bf16.msra.mxu2 %v2101_v62 }
  0x98   : > { %963 = vmatpush.bf16.msra.mxu1 %v2162_v61  ;;  %v2180_v61 = vld [vmem:[%s3137_s6 + $0x74] sm:$0xf] }
  0x99   : > { %v2105_v2 = vor.u32 %v2180_v61, %v2102_v63 }
  0x9b   : > { %1995 = vmatmul.msk.bf16.gmra.mxu0 %vm681_vm1, %v661_v42  ;;  %v653_v42 = vld [vmem:[%s2626_s26 + $0xc8] sm:$0xff]  ;;  %1284 = vmatpush.bf16.msra.mxu3 %v2105_v2 }
  0x9c   : > { %v672_v44 = vpack.c.bf16 %v653_v42, %v652_v41  ;;  %v2060_v41 = vld [vmem:[%s3137_s6 + $0x20] sm:$0xf]  ;;  %v2171_v42 = vld [vmem:[%s3137_s6 + $0x24] sm:$0xf0] }
  0xab   : > { %1996 = vmatmul.msk.bf16.gmra.mxu0 %vm681_vm1, %v662_v45 }
  0xbb   : > { %1997 = vmatmul.msk.bf16.gmra.mxu0 %vm681_vm1, %v663_v48 }
  0xcb   : > { %1998 = vmatmul.msk.bf16.gmra.mxu0 %vm681_vm1, %v664_v51  ;;  %v654_v51 = vld [vmem:[%s2626_s26 + $0xd0] sm:$0xff] }
  0xdb   : > { %1999 = vmatmul.msk.bf16.gmra.mxu0 %vm681_vm1, %v665_v54  ;;  %v673_v54 = vpack.c.bf16 %v655_v52, %v654_v51  ;;  %v2168_v51 = vld [vmem:[%s3137_s6 + $0x14] sm:$0xf] }
  0xeb   : > { %2000 = vmatmul.msk.bf16.gmra.mxu0 %vm681_vm1, %v666_v58 }
  0xfb   : > { %2001 = vmatmul.msk.bf16.gmra.mxu0 %vm681_vm1, %v667_v0 }
 0x108   : > { %v743_v4 = vpop.f32.mrf.mxu0 }
 0x109   : > { %v744_v6 = vadd.f32 %v2676_v5, %v743_v4  ;;  %v657_v4 = vld [vmem:[%s2626_s26 + $0xe8] sm:$0xff] }
 0x10b   : > { %2002 = vmatmul.msk.bf16.gmra.mxu0 %vm681_vm1, %v668_v3  ;;  %v823_v9 = vmax.f32 %v744_v6, 0.0  ;;  %v656_v3 = vld [vmem:[%s2626_s26 + $0xe0] sm:$0xff] }
 0x10c   : > { %v674_v12 = vpack.c.bf16 %v657_v4, %v656_v3 }
 0x110   : > { %v745_v7 = vpop.f32.mrf.mxu0 }
 0x111   : > { %v746_v8 = vadd.f32 %v2676_v5, %v745_v7  ;;  %v2092_v7 = vld [vmem:[%s3137_s6 + $0x60] sm:$0xf] }
 0x113   : > { %v824_v10 = vmax.f32 %v746_v8, 0.0  ;;  %v2179_v8 = vld [vmem:[%s3137_s6 + $0x64] sm:$0xf0] }
 0x115   : > { %v855_v13 = vpack.c.bf16 %v824_v10, %v823_v9  ;;  %v2178_v9 = vld [vmem:[%s3137_s6 + $0x64] sm:$0xf]  ;;  %v2093_v10 = vor.u32 %v2179_v8, %v2092_v7 }
 0x117   : > { %2026 = vmatmul.msk.bf16.vlgmr.msra.gmra.mxu1 %vm907_vm2, %v855_v13  ;;  %v2097_v13 = vor.u32 %v2178_v9, %v2094_v11  ;;  %1196 = vmatpush.bf16.msra.mxu2 %v2093_v10 }
 0x118   : > { %v748_v15 = vpop.f32.mrf.mxu0 }
 0x119   : > { %v749_v16 = vadd.f32 %v2676_v5, %v748_v15  ;;  %1285 = vmatpush.bf16.msra.mxu3 %v2097_v13  ;;  %v2084_v15 = vld [vmem:[%s3137_s6 + $0x50] sm:$0xf] }
 0x11b   : > { %2003 = vmatmul.msk.bf16.gmra.mxu0 %vm681_vm1, %v669_v14  ;;  %v825_v19 = vmax.f32 %v749_v16, 0.0  ;;  %v2177_v16 = vld [vmem:[%s3137_s6 + $0x54] sm:$0xf0] }
 0x120   : > { %v750_v17 = vpop.f32.mrf.mxu0 }
 0x121   : > { %v751_v18 = vadd.f32 %v2676_v5, %v750_v17  ;;  %v2176_v17 = vld [vmem:[%s3137_s6 + $0x54] sm:$0xf] }
 0x123   : > { %v826_v20 = vmax.f32 %v751_v18, 0.0  ;;  %v2085_v18 = vor.u32 %v2177_v16, %v2084_v15 }
 0x125   : > { %v856_v23 = vpack.c.bf16 %v826_v20, %v825_v19  ;;  %v2086_v19 = vld [vmem:[%s3137_s6 + $0x58] sm:$0xf0]  ;;  %1197 = vmatpush.bf16.msra.mxu2 %v2085_v18 }
 0x126   : > { %v2089_v20 = vor.u32 %v2176_v17, %v2086_v19 }
 0x127   : > { %2027 = vmatmul.msk.bf16.gmra.mxu1 %vm907_vm2, %v856_v23  ;;  %v2174_v23 = vld [vmem:[%s3137_s6 + $0x44] sm:$0xf] }
 0x128   : > { %v753_v25 = vpop.f32.mrf.mxu0  ;;  %1286 = vmatpush.bf16.msra.mxu3 %v2089_v20 }
 0x129   : > { %v754_v26 = vadd.f32 %v2676_v5, %v753_v25  ;;  %v2078_v25 = vld [vmem:[%s3137_s6 + $0x48] sm:$0xf0] }
 0x12b   : > { %2004 = vmatmul.msk.bf16.gmra.mxu0 %vm681_vm1, %v670_v24  ;;  %v827_v29 = vmax.f32 %v754_v26, 0.0  ;;  %v2077_v24 = vor.u32 %v2175_v22, %v2076_v21 }
 0x12d   : > { %1198 = vmatpush.bf16.msra.mxu2 %v2077_v24 }
 0x130   : > { %v755_v27 = vpop.f32.mrf.mxu0 }
 0x131   : > { %v756_v28 = vadd.f32 %v2676_v5, %v755_v27  ;;  %v2081_v27 = vor.u32 %v2174_v23, %v2078_v25 }
 0x133   : > { %v828_v30 = vmax.f32 %v756_v28, 0.0  ;;  %1287 = vmatpush.bf16.msra.mxu3 %v2081_v27 }
 0x135   : > { %v857_v33 = vpack.c.bf16 %v828_v30, %v827_v29  ;;  %v2068_v30 = vld [vmem:[%s3137_s6 + $0x30] sm:$0xf] }
 0x137   : > { %2028 = vmatmul.msk.bf16.gmra.mxu1 %vm907_vm2, %v857_v33  ;;  %v2069_v33 = vor.u32 %v2173_v31, %v2068_v30 }
 0x138   : > { %v758_v35 = vpop.f32.mrf.mxu0 }
 0x139   : > { %v759_v36 = vadd.f32 %v2676_v5, %v758_v35  ;;  %1199 = vmatpush.bf16.msra.mxu2 %v2069_v33 }
 0x13b   : > { %2005 = vmatmul.msk.bf16.gmra.mxu0 %vm681_vm1, %v671_v34  ;;  %v829_v39 = vmax.f32 %v759_v36, 0.0  ;;  %v2070_v34 = vld [vmem:[%s3137_s6 + $0x38] sm:$0xf0] }
 0x140   : > { %v760_v37 = vpop.f32.mrf.mxu0 }
 0x141   : > { %v761_v38 = vadd.f32 %v2676_v5, %v760_v37  ;;  %v2073_v37 = vor.u32 %v2172_v32, %v2070_v34 }
 0x143   : > { %v830_v40 = vmax.f32 %v761_v38, 0.0  ;;  %v658_v38 = vld [vmem:[%s2626_s26 + $0xf0] sm:$0xff]  ;;  %1288 = vmatpush.bf16.msra.mxu3 %v2073_v37 }
 0x145   : > { %v858_v43 = vpack.c.bf16 %v830_v40, %v829_v39  ;;  %v659_v39 = vld [vmem:[%s2626_s26 + $0xf8] sm:$0xff] }
 0x147   : > { %2029 = vmatmul.msk.bf16.gmra.mxu1 %vm907_vm2, %v858_v43  ;;  %v2170_v43 = vld [vmem:[%s3137_s6 + $0x24] sm:$0xf] }
 0x148   : > { %v763_v45 = vpop.f32.mrf.mxu0 }
 0x149   : > { %v764_v46 = vadd.f32 %v2676_v5, %v763_v45  ;;  %v2062_v45 = vld [vmem:[%s3137_s6 + $0x28] sm:$0xf0] }
 0x14b   : > { %2006 = vmatmul.msk.bf16.gmra.mxu0 %vm681_vm1, %v672_v44  ;;  %v831_v49 = vmax.f32 %v764_v46, 0.0  ;;  %v2061_v44 = vor.u32 %v2171_v42, %v2060_v41  ;;  %v675_v46 = vpack.c.bf16 %v659_v39, %v658_v38 }
 0x14d   : > { %1200 = vmatpush.bf16.msra.mxu2 %v2061_v44 }
 0x150   : > { %v765_v47 = vpop.f32.mrf.mxu0 }
 0x151   : > { %v766_v48 = vadd.f32 %v2676_v5, %v765_v47  ;;  %v2065_v47 = vor.u32 %v2170_v43, %v2062_v45 }
 0x153   : > { %v832_v50 = vmax.f32 %v766_v48, 0.0  ;;  %1289 = vmatpush.bf16.msra.mxu3 %v2065_v47 }
 0x155   : > { %v859_v53 = vpack.c.bf16 %v832_v50, %v831_v49  ;;  %v2052_v49 = vld [vmem:[%s3137_s6 + $0x10] sm:$0xf]  ;;  %v2169_v50 = vld [vmem:[%s3137_s6 + $0x14] sm:$0xf0] }
 0x156   : > { %v2053_v52 = vor.u32 %v2169_v50, %v2052_v49 }
 0x157   : > { %2030 = vmatmul.msk.bf16.gmra.mxu1 %vm907_vm2, %v859_v53  ;;  %v2054_v53 = vld [vmem:[%s3137_s6 + $0x18] sm:$0xf0] }
 0x158   : > { %v768_v55 = vpop.f32.mrf.mxu0  ;;  %1201 = vmatpush.bf16.msra.mxu2 %v2053_v52 }
 0x159   : > { %v769_v56 = vadd.f32 %v2676_v5, %v768_v55  ;;  %v2044_v55 = vld [vmem:[%s3137_s6] sm:$0xf] }
 0x15b   : > { %2007 = vmatmul.msk.bf16.gmra.mxu0 %vm681_vm1, %v673_v54  ;;  %v833_v0 = vmax.f32 %v769_v56, 0.0  ;;  %v2057_v54 = vor.u32 %v2168_v51, %v2054_v53  ;;  %v2167_v56 = vld [vmem:[%s3137_s6 + $0x4] sm:$0xf0] }
 0x15d   : > { %1290 = vmatpush.bf16.msra.mxu3 %v2057_v54 }
 0x160   : > { %v770_v57 = vpop.f32.mrf.mxu0 }
 0x161   : > { %v771_v58 = vadd.f32 %v2676_v5, %v770_v57  ;;  %v2166_v57 = vld [vmem:[%s3137_s6 + $0x4] sm:$0xf] }
 0x162   : > { %v2049_v61 = vor.u32 %v2166_v57, %v2046_v59 }
 0x163   : > { %v834_v1 = vmax.f32 %v771_v58, 0.0  ;;  %v2045_v58 = vor.u32 %v2167_v56, %v2044_v55 }
 0x164   : > { %1291 = vmatpush.bf16.msra.mxu3 %v2049_v61 }
 0x165   : > { %v860_v6 = vpack.c.bf16 %v834_v1, %v833_v0  ;;  %1202 = vmatpush.bf16.msra.mxu2 %v2045_v58 }
 0x167   : > { %2031 = vmatmul.msk.bf16.gmra.mxu1 %vm907_vm2, %v860_v6 }
 0x168   : > { %v773_v14 = vpop.f32.mrf.mxu0 }
 0x169   : > { %v774_v26 = vadd.f32 %v2676_v5, %v773_v14 }
 0x16b   : > { %2008 = vmatmul.msk.bf16.gmra.mxu0 %vm681_vm1, %v674_v12  ;;  %v835_v35 = vmax.f32 %v774_v26, 0.0  ;;  %v2825_v12 = vld [vmem:[%s3136_s5] ss:$0 sm:$0xff] }
 0x170   : > { %v775_v28 = vpop.f32.mrf.mxu0 }
 0x171   : > { %v776_v29 = vadd.f32 %v2676_v5, %v775_v28 }
 0x173   : > { %v836_v36 = vmax.f32 %v776_v29, 0.0 }
 0x175   : > { %v861_v40 = vpack.c.bf16 %v836_v36, %v835_v35 }
 0x177   : > { %2032 = vmatmul.msk.bf16.gmra.mxu1 %vm907_vm2, %v861_v40 }
 0x178   : > { %v778_v48 = vpop.f32.mrf.mxu0 }
 0x179   : > { %v779_v60 = vadd.f32 %v2676_v5, %v778_v48 }
 0x17b   : > { %2009 = vmatmul.msk.bf16.gmra.mxu0 %vm681_vm1, %v675_v46  ;;  %v837_v0 = vmax.f32 %v779_v60, 0.0 }
 0x180   : > { %v780_v62 = vpop.f32.mrf.mxu0 }
 0x181   : > { %v781_v63 = vadd.f32 %v2676_v5, %v780_v62 }
 0x183   : > { %v838_v1 = vmax.f32 %v781_v63, 0.0 }
 0x185   : > { %v862_v2 = vpack.c.bf16 %v838_v1, %v837_v0 }
 0x187   : > { %2033 = vmatmul.msk.bf16.gmra.mxu1 %vm907_vm2, %v862_v2 }
 0x188   : > { %v783_v3 = vpop.f32.mrf.mxu0 }
 0x189   : > { %v784_v4 = vadd.f32 %v2676_v5, %v783_v3 }
 0x18b   : > { %v839_v8 = vmax.f32 %v784_v4, 0.0 }
 0x190   : > { %v785_v6 = vpop.f32.mrf.mxu0 }
 0x191   : > { %v786_v7 = vadd.f32 %v2676_v5, %v785_v6 }
 0x193   : > { %v840_v9 = vmax.f32 %v786_v7, 0.0 }
 0x194   : > { %v965_v10 = vpop.f32.mrf.mxu1 }
 0x195   : > { %v863_v11 = vpack.c.bf16 %v840_v9, %v839_v8  ;;  %v966_v14 = vadd.f32 %v2825_v12, %v965_v10 }
 0x197   : > { %2034 = vmatmul.msk.bf16.gmra.mxu1 %vm907_vm2, %v863_v11  ;;  %v1045_v17 = vmax.f32 %v966_v14, 0.0 }
 0x198   : > { %v788_v13 = vpop.f32.mrf.mxu0 }
 0x199   : > { %v789_v18 = vadd.f32 %v2676_v5, %v788_v13 }
 0x19b   : > { %v841_v23 = vmax.f32 %v789_v18, 0.0 }
 0x19c   : > { %v967_v15 = vpop.f32.mrf.mxu1 }
 0x19d   : > { %v968_v16 = vadd.f32 %v2825_v12, %v967_v15 }
 0x19f   : > { %v1046_v19 = vmax.f32 %v968_v16, 0.0 }
 0x1a0   : > { %v790_v20 = vpop.f32.mrf.mxu0 }
 0x1a1   : > { %v791_v21 = vadd.f32 %v2676_v5, %v790_v20  ;;  %v1077_v22 = vpack.c.bf16 %v1046_v19, %v1045_v17 }
 0x1a3   : > { %v842_v24 = vmax.f32 %v791_v21, 0.0  ;;  %1203 = vmatmul.bf16.vlgmr.msra.gmra.mxu2 %v1077_v22  ;;  %1292 = vmatmul.bf16.vlgmr.msra.gmra.mxu3 %v1077_v22 }
 0x1a4   : > { %v970_v25 = vpop.f32.mrf.mxu1 }
 0x1a5   : > { %v864_v26 = vpack.c.bf16 %v842_v24, %v841_v23  ;;  %v971_v28 = vadd.f32 %v2825_v12, %v970_v25 }
 0x1a7   : > { %2035 = vmatmul.msk.bf16.gmra.mxu1 %vm907_vm2, %v864_v26  ;;  %v1047_v31 = vmax.f32 %v971_v28, 0.0 }
 0x1a8   : > { %v793_v27 = vpop.f32.mrf.mxu0 }
 0x1a9   : > { %v794_v32 = vadd.f32 %v2676_v5, %v793_v27 }
 0x1ab   : > { %v843_v37 = vmax.f32 %v794_v32, 0.0 }
 0x1ac   : > { %v972_v29 = vpop.f32.mrf.mxu1 }
 0x1ad   : > { %v973_v30 = vadd.f32 %v2825_v12, %v972_v29 }
 0x1af   : > { %v1048_v33 = vmax.f32 %v973_v30, 0.0 }
 0x1b0   : > { %v795_v34 = vpop.f32.mrf.mxu0 }
 0x1b1   : > { %v796_v35 = vadd.f32 %v2676_v5, %v795_v34  ;;  %v1078_v36 = vpack.c.bf16 %v1048_v33, %v1047_v31 }
 0x1b3   : > { %v844_v38 = vmax.f32 %v796_v35, 0.0  ;;  %1208 = vmatmul.bf16.gmra.mxu2 %v1078_v36  ;;  %1297 = vmatmul.bf16.gmra.mxu3 %v1078_v36 }
 0x1b4   : > { %v975_v39 = vpop.f32.mrf.mxu1 }
 0x1b5   : > { %v865_v40 = vpack.c.bf16 %v844_v38, %v843_v37  ;;  %v976_v42 = vadd.f32 %v2825_v12, %v975_v39 }
 0x1b7   : > { %2036 = vmatmul.msk.bf16.gmra.mxu1 %vm907_vm2, %v865_v40  ;;  %v1049_v45 = vmax.f32 %v976_v42, 0.0 }
 0x1b8   : > { %v798_v41 = vpop.f32.mrf.mxu0 }
 0x1b9   : > { %v799_v46 = vadd.f32 %v2676_v5, %v798_v41 }
 0x1bb   : > { %v845_v51 = vmax.f32 %v799_v46, 0.0 }
 0x1bc   : > { %v977_v43 = vpop.f32.mrf.mxu1 }
 0x1bd   : > { %v978_v44 = vadd.f32 %v2825_v12, %v977_v43 }
 0x1bf   : > { %v1050_v47 = vmax.f32 %v978_v44, 0.0 }
 0x1c0   : > { %v800_v48 = vpop.f32.mrf.mxu0 }
 0x1c1   : > { %v801_v49 = vadd.f32 %v2676_v5, %v800_v48  ;;  %v1079_v50 = vpack.c.bf16 %v1050_v47, %v1049_v45 }
 0x1c3   : > { %v846_v52 = vmax.f32 %v801_v49, 0.0  ;;  %1213 = vmatmul.bf16.gmra.mxu2 %v1079_v50  ;;  %1302 = vmatmul.bf16.gmra.mxu3 %v1079_v50 }
 0x1c4   : > { %v980_v53 = vpop.f32.mrf.mxu1 }
 0x1c5   : > { %v866_v54 = vpack.c.bf16 %v846_v52, %v845_v51  ;;  %v981_v56 = vadd.f32 %v2825_v12, %v980_v53 }
 0x1c7   : > { %2037 = vmatmul.msk.bf16.gmra.mxu1 %vm907_vm2, %v866_v54  ;;  %v1051_v59 = vmax.f32 %v981_v56, 0.0 }
 0x1c8   : > { %v803_v55 = vpop.f32.mrf.mxu0 }
 0x1c9   : > { %v804_v60 = vadd.f32 %v2676_v5, %v803_v55 }
 0x1cb   : > { %v847_v1 = vmax.f32 %v804_v60, 0.0 }
 0x1cc   : > { %v982_v57 = vpop.f32.mrf.mxu1 }
 0x1cd   : > { %v983_v58 = vadd.f32 %v2825_v12, %v982_v57 }
 0x1cf   : > { %v1052_v61 = vmax.f32 %v983_v58, 0.0 }
 0x1d0   : > { %v805_v62 = vpop.f32.mrf.mxu0 }
 0x1d1   : > { %v806_v63 = vadd.f32 %v2676_v5, %v805_v62  ;;  %v1080_v0 = vpack.c.bf16 %v1052_v61, %v1051_v59  ;;  %v1109_v62 = vld [vmem:[%s3138_s7] sm:$0x3] }
 0x1d3   : > { %v848_v2 = vmax.f32 %v806_v63, 0.0  ;;  %1218 = vmatmul.bf16.gmra.mxu2 %v1080_v0  ;;  %1307 = vmatmul.bf16.gmra.mxu3 %v1080_v0 }
 0x1d4   : > { %v985_v3 = vpop.f32.mrf.mxu1 }
 0x1d5   : > { %v867_v4 = vpack.c.bf16 %v848_v2, %v847_v1  ;;  %v986_v7 = vadd.f32 %v2825_v12, %v985_v3  ;;  %v2870_v1 = vperm.slane %v1109_v62, 0  ;;  %v2872_v2 = vperm.slane %v1109_v62, 1 }
 0x1d7   : > { %2038 = vmatmul.msk.bf16.gmra.mxu1 %vm907_vm2, %v867_v4  ;;  %v1053_v10 = vmax.f32 %v986_v7, 0.0 }
 0x1d8   : > { %v808_v6 = vpop.f32.mrf.mxu0 }
 0x1d9   : > { %v809_v11 = vadd.f32 %v2676_v5, %v808_v6 }
 0x1db   : > { %v849_v17 = vmax.f32 %v809_v11, 0.0 }
 0x1dc   : > { %v987_v8 = vpop.f32.mrf.mxu1 }
 0x1dd   : > { %v988_v9 = vadd.f32 %v2825_v12, %v987_v8 }
 0x1df   : > { %v1054_v13 = vmax.f32 %v988_v9, 0.0 }
 0x1e0   : > { %v810_v14 = vpop.f32.mrf.mxu0 }
 0x1e1   : > { %v811_v15 = vadd.f32 %v2676_v5, %v810_v14  ;;  %v1081_v16 = vpack.c.bf16 %v1054_v13, %v1053_v10 }
 0x1e3   : > { %v850_v18 = vmax.f32 %v811_v15, 0.0  ;;  %1223 = vmatmul.bf16.gmra.mxu2 %v1081_v16  ;;  %1312 = vmatmul.bf16.gmra.mxu3 %v1081_v16 }
 0x1e4   : > { %v990_v19 = vpop.f32.mrf.mxu1 }
 0x1e5   : > { %v868_v20 = vpack.c.bf16 %v850_v18, %v849_v17  ;;  %v991_v22 = vadd.f32 %v2825_v12, %v990_v19 }
 0x1e7   : > { %2039 = vmatmul.msk.bf16.gmra.mxu1 %vm907_vm2, %v868_v20  ;;  %v1055_v25 = vmax.f32 %v991_v22, 0.0 }
 0x1e8   : > { %v813_v21 = vpop.f32.mrf.mxu0 }
 0x1e9   : > { %v814_v26 = vadd.f32 %v2676_v5, %v813_v21 }
 0x1eb   : > { %v851_v31 = vmax.f32 %v814_v26, 0.0 }
 0x1ec   : > { %v992_v23 = vpop.f32.mrf.mxu1 }
 0x1ed   : > { %v993_v24 = vadd.f32 %v2825_v12, %v992_v23 }
 0x1ef   : > { %v1056_v27 = vmax.f32 %v993_v24, 0.0 }
 0x1f0   : > { %v815_v28 = vpop.f32.mrf.mxu0 }
 0x1f1   : > { %v816_v29 = vadd.f32 %v2676_v5, %v815_v28  ;;  %v1082_v30 = vpack.c.bf16 %v1056_v27, %v1055_v25 }
 0x1f3   : > { %v852_v32 = vmax.f32 %v816_v29, 0.0  ;;  %1228 = vmatmul.bf16.gmra.mxu2 %v1082_v30  ;;  %1317 = vmatmul.bf16.gmra.mxu3 %v1082_v30 }
 0x1f4   : > { %v995_v33 = vpop.f32.mrf.mxu1 }
 0x1f5   : > { %v869_v34 = vpack.c.bf16 %v852_v32, %v851_v31  ;;  %v996_v36 = vadd.f32 %v2825_v12, %v995_v33 }
 0x1f7   : > { %2040 = vmatmul.msk.bf16.gmra.mxu1 %vm907_vm2, %v869_v34  ;;  %v1057_v39 = vmax.f32 %v996_v36, 0.0 }
 0x1f8   : > { %v818_v35 = vpop.f32.mrf.mxu0 }
 0x1f9   : > { %v819_v40 = vadd.f32 %v2676_v5, %v818_v35 }
 0x1fb   : > { %v853_v45 = vmax.f32 %v819_v40, 0.0 }
 0x1fc   : > { %v997_v37 = vpop.f32.mrf.mxu1 }
 0x1fd   : > { %v998_v38 = vadd.f32 %v2825_v12, %v997_v37 }
 0x1ff   : > { %v1058_v41 = vmax.f32 %v998_v38, 0.0 }
 0x200   : > { %v820_v42 = vpop.f32.mrf.mxu0 }
 0x201   : > { %v821_v43 = vadd.f32 %v2676_v5, %v820_v42  ;;  %v1083_v44 = vpack.c.bf16 %v1058_v41, %v1057_v39 }
 0x203   : > { %v854_v46 = vmax.f32 %v821_v43, 0.0  ;;  %1233 = vmatmul.bf16.gmra.mxu2 %v1083_v44  ;;  %1322 = vmatmul.bf16.gmra.mxu3 %v1083_v44 }
 0x204   : > { %v1000_v47 = vpop.f32.mrf.mxu1 }
 0x205   : > { %v870_v48 = vpack.c.bf16 %v854_v46, %v853_v45  ;;  %v1001_v49 = vadd.f32 %v2825_v12, %v1000_v47 }
 0x207   : > { %2041 = vmatmul.msk.bf16.gmra.mxu1 %vm907_vm2, %v870_v48  ;;  %v1059_v52 = vmax.f32 %v1001_v49, 0.0 }
 0x20c   : > { %v1002_v50 = vpop.f32.mrf.mxu1 }
 0x20d   : > { %v1003_v51 = vadd.f32 %v2825_v12, %v1002_v50 }
 0x20f   : > { %v1060_v53 = vmax.f32 %v1003_v51, 0.0 }
 0x211   : > { %v1084_v54 = vpack.c.bf16 %v1060_v53, %v1059_v52 }
 0x213   : > { %1238 = vmatmul.bf16.gmra.mxu2 %v1084_v54  ;;  %1327 = vmatmul.bf16.gmra.mxu3 %v1084_v54 }
 0x214   : > { %v1005_v5 = vpop.f32.mrf.mxu1 }
 0x215   : > { %v1006_v55 = vadd.f32 %v2825_v12, %v1005_v5 }
 0x217   : > { %v1061_v58 = vmax.f32 %v1006_v55, 0.0 }
 0x21c   : > { %v1007_v56 = vpop.f32.mrf.mxu1 }
 0x21d   : > { %v1008_v57 = vadd.f32 %v2825_v12, %v1007_v56 }
 0x21f   : > { %v1062_v59 = vmax.f32 %v1008_v57, 0.0 }
 0x221   : > { %v1085_v60 = vpack.c.bf16 %v1062_v59, %v1061_v58 }
 0x223   : > { %1243 = vmatmul.bf16.gmra.mxu2 %v1085_v60  ;;  %1332 = vmatmul.bf16.gmra.mxu3 %v1085_v60 }
 0x224   : > { %v1010_v61 = vpop.f32.mrf.mxu1 }
 0x225   : > { %v1011_v3 = vadd.f32 %v2825_v12, %v1010_v61 }
 0x226   : > { %v1204_v63 = vpop.f32.mrf.mxu2  ;;  %v1293_v0 = vpop.f32.mrf.mxu3 }
 0x227   : > { %v1205_v4 = vadd.f32 %v1204_v63, %v2870_v1  ;;  %v1294_v7 = vadd.f32 %v1293_v0, %v2872_v2  ;;  %v1063_v11 = vmax.f32 %v1011_v3, 0.0 }
 0x229   : > { %v1373_v16 = vmax.f32 %v1205_v4, 0.0  ;;  %v1374_v17 = vmax.f32 %v1294_v7, 0.0 }
 0x22c   : > { %v1012_v6 = vpop.f32.mrf.mxu1 }
 0x22d   : > { %v1013_v8 = vadd.f32 %v2825_v12, %v1012_v6 }
 0x22e   : > { %v1206_v9 = vpop.f32.mrf.mxu2  ;;  %v1295_v10 = vpop.f32.mrf.mxu3 }
 0x22f   : > { %v1064_v13 = vmax.f32 %v1013_v8, 0.0  ;;  %v1207_v14 = vadd.f32 %v1206_v9, %v2870_v1  ;;  %v1296_v15 = vadd.f32 %v1295_v10, %v2872_v2 }
 0x231   : > { %v1375_v18 = vmax.f32 %v1207_v14, 0.0  ;;  %v1376_v19 = vmax.f32 %v1296_v15, 0.0  ;;  %v1086_v20 = vpack.c.bf16 %v1064_v13, %v1063_v11 }
 0x233   : > { %1248 = vmatmul.bf16.gmra.mxu2 %v1086_v20  ;;  %1337 = vmatmul.bf16.gmra.mxu3 %v1086_v20  ;;  %v2880_v21 = vpack.c.bf16 %v1375_v18, %v1373_v16  ;;  %v2882_v22 = vpack.c.bf16 %v1376_v19, %v1374_v17 }
 0x234   : > { %v1015_v23 = vpop.f32.mrf.mxu1 }
 0x235   : > { %v1016_v26 = vadd.f32 %v2825_v12, %v1015_v23 }
 0x236   : > { %v1209_v24 = vpop.f32.mrf.mxu2  ;;  %v1298_v25 = vpop.f32.mrf.mxu3 }
 0x237   : > { %v1210_v27 = vadd.f32 %v1209_v24, %v2870_v1  ;;  %v1299_v29 = vadd.f32 %v1298_v25, %v2872_v2  ;;  %v1065_v33 = vmax.f32 %v1016_v26, 0.0 }
 0x239   : > { %v1377_v37 = vmax.f32 %v1210_v27, 0.0  ;;  %v1378_v38 = vmax.f32 %v1299_v29, 0.0 }
 0x23c   : > { %v1017_v28 = vpop.f32.mrf.mxu1 }
 0x23d   : > { %v1018_v30 = vadd.f32 %v2825_v12, %v1017_v28 }
 0x23e   : > { %v1211_v31 = vpop.f32.mrf.mxu2  ;;  %v1300_v32 = vpop.f32.mrf.mxu3 }
 0x23f   : > { %v1066_v34 = vmax.f32 %v1018_v30, 0.0  ;;  %v1212_v35 = vadd.f32 %v1211_v31, %v2870_v1  ;;  %v1301_v36 = vadd.f32 %v1300_v32, %v2872_v2 }
 0x241   : > { %v1379_v39 = vmax.f32 %v1212_v35, 0.0  ;;  %v1380_v40 = vmax.f32 %v1301_v36, 0.0  ;;  %v1087_v41 = vpack.c.bf16 %v1066_v34, %v1065_v33 }
 0x243   : > { %1253 = vmatmul.bf16.gmra.mxu2 %v1087_v41  ;;  %1342 = vmatmul.bf16.gmra.mxu3 %v1087_v41  ;;  %v2890_v42 = vpack.c.bf16 %v1379_v39, %v1377_v37  ;;  %v2892_v43 = vpack.c.bf16 %v1380_v40, %v1378_v38 }
 0x244   : > { %v1020_v44 = vpop.f32.mrf.mxu1 }
 0x245   : > { %v1021_v47 = vadd.f32 %v2825_v12, %v1020_v44 }
 0x246   : > { %v1214_v45 = vpop.f32.mrf.mxu2  ;;  %v1303_v46 = vpop.f32.mrf.mxu3 }
 0x247   : > { %v1215_v48 = vadd.f32 %v1214_v45, %v2870_v1  ;;  %v1304_v50 = vadd.f32 %v1303_v46, %v2872_v2  ;;  %v1067_v54 = vmax.f32 %v1021_v47, 0.0 }
 0x249   : > { %v1381_v57 = vmax.f32 %v1215_v48, 0.0  ;;  %v1382_v58 = vmax.f32 %v1304_v50, 0.0 }
 0x24c   : > { %v1022_v49 = vpop.f32.mrf.mxu1 }
 0x24d   : > { %v1023_v51 = vadd.f32 %v2825_v12, %v1022_v49 }
 0x24e   : > { %v1216_v52 = vpop.f32.mrf.mxu2  ;;  %v1305_v53 = vpop.f32.mrf.mxu3 }
 0x24f   : > { %v1068_v5 = vmax.f32 %v1023_v51, 0.0  ;;  %v1217_v55 = vadd.f32 %v1216_v52, %v2870_v1  ;;  %v1306_v56 = vadd.f32 %v1305_v53, %v2872_v2 }
 0x251   : > { %v1383_v59 = vmax.f32 %v1217_v55, 0.0  ;;  %v1384_v60 = vmax.f32 %v1306_v56, 0.0  ;;  %v1088_v61 = vpack.c.bf16 %v1068_v5, %v1067_v54 }
 0x253   : > { %1258 = vmatmul.bf16.gmra.mxu2 %v1088_v61  ;;  %1347 = vmatmul.bf16.gmra.mxu3 %v1088_v61  ;;  %v2900_v62 = vpack.c.bf16 %v1383_v59, %v1381_v57  ;;  %v2902_v63 = vpack.c.bf16 %v1384_v60, %v1382_v58 }
 0x254   : > { %v1025_v0 = vpop.f32.mrf.mxu1 }
 0x255   : > { %v1026_v6 = vadd.f32 %v2825_v12, %v1025_v0 }
 0x256   : > { %v1219_v3 = vpop.f32.mrf.mxu2  ;;  %v1308_v4 = vpop.f32.mrf.mxu3 }
 0x257   : > { %v1220_v7 = vadd.f32 %v1219_v3, %v2870_v1  ;;  %v1309_v9 = vadd.f32 %v1308_v4, %v2872_v2  ;;  %v1069_v14 = vmax.f32 %v1026_v6, 0.0 }
 0x259   : > { %v1385_v18 = vmax.f32 %v1220_v7, 0.0  ;;  %v1386_v19 = vmax.f32 %v1309_v9, 0.0 }
 0x25c   : > { %v1027_v8 = vpop.f32.mrf.mxu1 }
 0x25d   : > { %v1028_v10 = vadd.f32 %v2825_v12, %v1027_v8 }
 0x25e   : > { %v1221_v11 = vpop.f32.mrf.mxu2  ;;  %v1310_v13 = vpop.f32.mrf.mxu3 }
 0x25f   : > { %v1070_v15 = vmax.f32 %v1028_v10, 0.0  ;;  %v1222_v16 = vadd.f32 %v1221_v11, %v2870_v1  ;;  %v1311_v17 = vadd.f32 %v1310_v13, %v2872_v2 }
 0x261   : > { %v1089_v20 = vpack.c.bf16 %v1070_v15, %v1069_v14  ;;  %v1387_v23 = vmax.f32 %v1222_v16, 0.0  ;;  %v1388_v24 = vmax.f32 %v1311_v17, 0.0 }
 0x263   : > { %1263 = vmatmul.bf16.gmra.mxu2 %v1089_v20  ;;  %1352 = vmatmul.bf16.gmra.mxu3 %v1089_v20  ;;  %v2910_v25 = vpack.c.bf16 %v1387_v23, %v1385_v18  ;;  %v2912_v26 = vpack.c.bf16 %v1388_v24, %v1386_v19 }
 0x264   : > { %v1030_v27 = vpop.f32.mrf.mxu1 }
 0x265   : > { %v1031_v30 = vadd.f32 %v2825_v12, %v1030_v27 }
 0x266   : > { %v2914_v28 = vpop.f32.mrf.mxu2  ;;  %v2916_v29 = vpop.f32.mrf.mxu3 }
 0x267   : > { %v1071_v35 = vmax.f32 %v1031_v30, 0.0 }
 0x26c   : > { %v1032_v31 = vpop.f32.mrf.mxu1 }
 0x26d   : > { %v1033_v32 = vadd.f32 %v2825_v12, %v1032_v31 }
 0x26e   : > { %v1226_v33 = vpop.f32.mrf.mxu2  ;;  %v1315_v34 = vpop.f32.mrf.mxu3 }
 0x26f   : > { %v1072_v36 = vmax.f32 %v1033_v32, 0.0 }
 0x271   : > { %v1090_v37 = vpack.c.bf16 %v1072_v36, %v1071_v35  ;;  %v1227_v36 = vadd.f32 %v1226_v33, %v2870_v1 }
 0x273   : > { %1268 = vmatmul.bf16.gmra.mxu2 %v1090_v37  ;;  %1357 = vmatmul.bf16.gmra.mxu3 %v1090_v37  ;;  %v1316_v37 = vadd.f32 %v1315_v34, %v2872_v2 }
 0x274   : > { %v1035_v38 = vpop.f32.mrf.mxu1 }
 0x275   : > { %v1036_v41 = vadd.f32 %v2825_v12, %v1035_v38  ;;  %v1392_v33 = vmax.f32 %v1316_v37, 0.0 }
 0x276   : > { %v1229_v39 = vpop.f32.mrf.mxu2  ;;  %v1318_v40 = vpop.f32.mrf.mxu3 }
 0x277   : > { %v1073_v48 = vmax.f32 %v1036_v41, 0.0  ;;  %v1230_v30 = vadd.f32 %v1229_v39, %v2870_v1  ;;  %v1319_v31 = vadd.f32 %v1318_v40, %v2872_v2  ;;  %v1314_v39 = vadd.f32 %v2916_v29, %v2872_v2 }
 0x279   : > { %v1393_v40 = vmax.f32 %v1230_v30, 0.0 }
 0x27c   : > { %v1037_v44 = vpop.f32.mrf.mxu1 }
 0x27d   : > { %v1038_v45 = vadd.f32 %v2825_v12, %v1037_v44 }
 0x27e   : > { %v1231_v46 = vpop.f32.mrf.mxu2  ;;  %v1320_v47 = vpop.f32.mrf.mxu3 }
 0x27f   : > { %v1074_v49 = vmax.f32 %v1038_v45, 0.0  ;;  %v1232_v18 = vadd.f32 %v1231_v46, %v2870_v1  ;;  %v1321_v19 = vadd.f32 %v1320_v47, %v2872_v2 }
 0x281   : > { %v1091_v50 = vpack.c.bf16 %v1074_v49, %v1073_v48  ;;  %v1395_v44 = vmax.f32 %v1232_v18, 0.0  ;;  %v1396_v45 = vmax.f32 %v1321_v19, 0.0  ;;  %v1225_v48 = vadd.f32 %v2914_v28, %v2870_v1 }
 0x282   : > { %v1394_v49 = vmax.f32 %v1319_v31, 0.0 }
 0x283   : > { %1273 = vmatmul.bf16.gmra.mxu2 %v1091_v50  ;;  %1362 = vmatmul.bf16.gmra.mxu3 %v1091_v50  ;;  %v1391_v50 = vmax.f32 %v1227_v36, 0.0 }
 0x284   : > { %v1040_v51 = vpop.f32.mrf.mxu1  ;;  %v1486_v34 = vpack.c.bf16 %v1396_v45, %v1394_v49 }
 0x285   : > { %v1041_v54 = vadd.f32 %v2825_v12, %v1040_v51  ;;  %v1485_v51 = vpack.c.bf16 %v1395_v44, %v1393_v40 }
 0x286   : > { %v1234_v52 = vpop.f32.mrf.mxu2  ;;  %v1323_v53 = vpop.f32.mrf.mxu3 }
 0x287   : > { %v1075_v58 = vmax.f32 %v1041_v54, 0.0  ;;  %v1235_v11 = vadd.f32 %v1234_v52, %v2870_v1  ;;  %v1324_v13 = vadd.f32 %v1323_v53, %v2872_v2  ;;  %v1389_v52 = vmax.f32 %v1225_v48, 0.0 }
 0x288   : > { %v1390_v53 = vmax.f32 %v1314_v39, 0.0 }
 0x289   : > { %v1397_v32 = vmax.f32 %v1235_v11, 0.0  ;;  %v1398_v35 = vmax.f32 %v1324_v13, 0.0 }
 0x28c   : > { %v1042_v5 = vpop.f32.mrf.mxu1 }
 0x28d   : > { %v1043_v55 = vadd.f32 %v2825_v12, %v1042_v5 }
 0x28e   : > { %v1236_v56 = vpop.f32.mrf.mxu2  ;;  %v1325_v57 = vpop.f32.mrf.mxu3 }
 0x28f   : > { %v1076_v59 = vmax.f32 %v1043_v55, 0.0  ;;  %v1237_v8 = vadd.f32 %v1236_v56, %v2870_v1  ;;  %v1326_v9 = vadd.f32 %v1325_v57, %v2872_v2  ;;  %v1483_v57 = vpack.c.bf16 %v1391_v50, %v1389_v52 }
 0x291   : > { %v1092_v60 = vpack.c.bf16 %v1076_v59, %v1075_v58  ;;  %v1399_v20 = vmax.f32 %v1237_v8, 0.0  ;;  %v1400_v23 = vmax.f32 %v1326_v9, 0.0  ;;  %v1484_v58 = vpack.c.bf16 %v1392_v33, %v1390_v53 }
 0x293   : > { %1278 = vmatmul.bf16.gmra.mxu2 %v1092_v60  ;;  %1367 = vmatmul.bf16.gmra.mxu3 %v1092_v60  ;;  %v1487_v46 = vpack.c.bf16 %v1399_v20, %v1397_v32  ;;  %v1488_v47 = vpack.c.bf16 %v1400_v23, %v1398_v35 }
 0x296   : > { %v1239_v61 = vpop.f32.mrf.mxu2  ;;  %v1328_v0 = vpop.f32.mrf.mxu3 }
 0x297   : > { %v1240_v3 = vadd.f32 %v1239_v61, %v2870_v1  ;;  %v1329_v4 = vadd.f32 %v1328_v0, %v2872_v2 }
 0x299   : > { %v1401_v14 = vmax.f32 %v1240_v3, 0.0  ;;  %v1402_v15 = vmax.f32 %v1329_v4, 0.0 }
 0x29e   : > { %v1241_v6 = vpop.f32.mrf.mxu2  ;;  %v1330_v7 = vpop.f32.mrf.mxu3 }
 0x29f   : > { %v1242_v12 = vadd.f32 %v1241_v6, %v2870_v1  ;;  %v1331_v10 = vadd.f32 %v1330_v7, %v2872_v2 }
 0x2a1   : > { %v1403_v16 = vmax.f32 %v1242_v12, 0.0  ;;  %v1404_v17 = vmax.f32 %v1331_v10, 0.0 }
 0x2a3   : > { %v1489_v24 = vpack.c.bf16 %v1403_v16, %v1401_v14  ;;  %v1490_v27 = vpack.c.bf16 %v1404_v17, %v1402_v15 }
 0x2a5   : > { %1507 = vmatpush.bf16.msrb.mxu0 %v1489_v24  ;;  %1536 = vmatpush.bf16.msrb.mxu1 %v1490_v27 }
 0x2a6   : > { %v1244_v38 = vpop.f32.mrf.mxu2  ;;  %v1333_v41 = vpop.f32.mrf.mxu3 }
 0x2a7   : > { %v1245_v54 = vadd.f32 %v1244_v38, %v2870_v1  ;;  %v1334_v5 = vadd.f32 %v1333_v41, %v2872_v2 }
 0x2a9   : > { %1508 = vmatpush.bf16.msrb.mxu0 %v1487_v46  ;;  %1537 = vmatpush.bf16.msrb.mxu1 %v1488_v47  ;;  %v1405_v59 = vmax.f32 %v1245_v54, 0.0  ;;  %v1406_v60 = vmax.f32 %v1334_v5, 0.0  ;;  %v2394_v54 = vmov 0.25  }
 0x2aa   : > { %2279 = vrcp.f32 %v2394_v54 }
 0x2ad   : > { %1509 = vmatpush.bf16.msrb.mxu0 %v1485_v51  ;;  %1538 = vmatpush.bf16.msrb.mxu1 %v1486_v34 }
 0x2ae   : > { %v1246_v28 = vpop.f32.mrf.mxu2  ;;  %v1335_v55 = vpop.f32.mrf.mxu3 }
 0x2af   : > { %v1247_v29 = vadd.f32 %v1246_v28, %v2870_v1  ;;  %v1336_v56 = vadd.f32 %v1335_v55, %v2872_v2 }
 0x2b0   : > { %v2280_v55 = vpop.eup %2279 }
 0x2b1   : > { %v1407_v61 = vmax.f32 %v1247_v29, 0.0  ;;  %v1408_v0 = vmax.f32 %v1336_v56, 0.0  ;;  %1510 = vmatpush.bf16.msrb.mxu0 %v1483_v57  ;;  %1539 = vmatpush.bf16.msrb.mxu1 %v1484_v58  ;;  %v596_v29 = vmul.f32 0.25, %v2280_v55  ;;  %vm600_vm3 = vweird.f32 %v2280_v55 }
 0x2b3   : > { %v2946_v3 = vpack.c.bf16 %v1407_v61, %v1405_v59  ;;  %v2948_v4 = vpack.c.bf16 %v1408_v0, %v1406_v60  ;;  %v597_v58 = vsub.f32 1.0, %v596_v29  ;;  %v593_v0 = vld [vmem:[%s518_s20] sm:$0x7] }
 0x2b5   : > { %1511 = vmatpush.bf16.msrb.mxu0 %v2910_v25  ;;  %1540 = vmatpush.bf16.msrb.mxu1 %v2912_v26  ;;  %v598_v59 = vmul.f32 %v2280_v55, %v597_v58 }
 0x2b6   : > { %v1249_v6 = vpop.f32.mrf.mxu2  ;;  %v1338_v7 = vpop.f32.mrf.mxu3 }
 0x2b7   : > { %v1250_v8 = vadd.f32 %v1249_v6, %v2870_v1  ;;  %v1339_v9 = vadd.f32 %v1338_v7, %v2872_v2  ;;  %v599_v60 = vadd.f32 %v2280_v55, %v598_v59 }
 0x2b9   : > { %1512 = vmatpush.bf16.msrb.mxu0 %v2900_v62  ;;  %1541 = vmatpush.bf16.msrb.mxu1 %v2902_v63  ;;  %v1409_v11 = vmax.f32 %v1250_v8, 0.0  ;;  %v1410_v13 = vmax.f32 %v1339_v9, 0.0  ;;  %v601_v61 = vsel %vm600_vm3, %v2280_v55, %v599_v60 }
 0x2ba   : > { %v602_v6 = vmul.f32 %v601_v61, %v593_v0 }
 0x2bc   : > { %v604_v9 = vfloor.f32 %v602_v6 }
 0x2bd   : > { %1513 = vmatpush.bf16.msrb.mxu0 %v2890_v42  ;;  %1542 = vmatpush.bf16.msrb.mxu1 %v2892_v43 }
 0x2be   : > { %v1251_v12 = vpop.f32.mrf.mxu2  ;;  %v1340_v10 = vpop.f32.mrf.mxu3 }
 0x2bf   : > { %v1252_v25 = vadd.f32 %v1251_v12, %v2870_v1  ;;  %v1341_v26 = vadd.f32 %v1340_v10, %v2872_v2  ;;  %v594_v12 = vld [vmem:[%s518_s20 + $0x4] sm:$0x7]  ;;  %v2184_v10 = vcvt.f32.s32 %v604_v9  ;;  %v2395_v9 = vmov 1.0|1.0  }
 0x2c1   : > { %v1411_v14 = vmax.f32 %v1252_v25, 0.0  ;;  %v1412_v62 = vmax.f32 %v1341_v26, 0.0  ;;  %1514 = vmatpush.bf16.msrb.mxu0 %v2880_v21  ;;  %1543 = vmatpush.bf16.msrb.mxu1 %v2882_v22  ;;  %v603_v25 = vmul.f32 %v601_v61, %v594_v12  ;;  %v610_v26 = vmul.u32 4, %v2184_v10 }
 0x2c3   : > { %v2962_v63 = vpack.c.bf16 %v1411_v14, %v1409_v11  ;;  %v2964_v15 = vpack.c.bf16 %v1412_v62, %v1410_v13  ;;  %v608_v11 = vmul.u32 16, %v2184_v10  ;;  %v612_v13 = vrot.slane %v610_v26, 1 }
 0x2c6   : > { %v1254_v42 = vpop.f32.mrf.mxu2  ;;  %v1343_v43 = vpop.f32.mrf.mxu3 }
 0x2c7   : > { %v1255_v16 = vadd.f32 %v1254_v42, %v2870_v1  ;;  %v1344_v17 = vadd.f32 %v1343_v43, %v2872_v2  ;;  %v605_v42 = vfloor.f32 %v603_v25  ;;  %v614_v43 = vadd.s32 %v612_v13, %v608_v11 }
 0x2c9   : > { %v1413_v24 = vmax.f32 %v1255_v16, 0.0  ;;  %v1414_v21 = vmax.f32 %v1344_v17, 0.0  ;;  %v616_v16 = vrot.slane %v2184_v10, 2  ;;  %v1437_v17 = vlaneseq }
 0x2ce   : > { %v1256_v18 = vpop.f32.mrf.mxu2  ;;  %v1345_v19 = vpop.f32.mrf.mxu3 }
 0x2cf   : > { %v1257_v20 = vadd.f32 %v1256_v18, %v2870_v1  ;;  %v1346_v23 = vadd.f32 %v1345_v19, %v2872_v2  ;;  %v618_v18 = vadd.s32 %v616_v16, %v614_v43  ;;  %v2998_v19 = vcvt.f32.s32 %v605_v42 }
 0x2d1   : > { %v1415_v27 = vmax.f32 %v1257_v20, 0.0  ;;  %v1416_v22 = vmax.f32 %v1346_v23, 0.0  ;;  %v3001_v23 = vshrl.u32 %v1437_v17, 7  ;;  %vm620_vm4 = vcmp.ge.s32.totalorder %v618_v18, 0 }
 0x2d2   : > { %vm622_vm5 = vcmp.lt.s32.totalorder %v618_v18, 64  ;;  %v617_v13 = vrot.slane %v2998_v19, 2 }
 0x2d3   : > { %v2970_v30 = vpack.c.bf16 %v1415_v27, %v1413_v24  ;;  %v2972_v31 = vpack.c.bf16 %v1416_v22, %v1414_v21  ;;  %vm624_vm6 = vmand %vm620_vm4, %vm622_vm5  ;;  %v1440_v16 = vadd.s32 16, %v3001_v23  ;;  %v1441_v17 = vadd.s32 24, %v3001_v23 }
 0x2d6   : > { %v1259_v32 = vpop.f32.mrf.mxu2  ;;  %v1348_v35 = vpop.f32.mrf.mxu3 }
 0x2d7   : > { %v1260_v36 = vadd.f32 %v1259_v32, %v2870_v1  ;;  %v1349_v37 = vadd.f32 %v1348_v35, %v2872_v2  ;;  %v3006_v32 = vadd.s32 8, %v3001_v23  ;;  %v626_v35 = vsel %vm624_vm6, %v618_v18, 4294967295 }
 0x2d9   : > { %v1417_v46 = vmax.f32 %v1260_v36, 0.0  ;;  %v1418_v47 = vmax.f32 %v1349_v37, 0.0 }
 0x2de   : > { %v1261_v38 = vpop.f32.mrf.mxu2  ;;  %v1350_v41 = vpop.f32.mrf.mxu3 }
 0x2df   : > { %v1262_v44 = vadd.f32 %v1261_v38, %v2870_v1  ;;  %v1351_v45 = vadd.f32 %v1350_v41, %v2872_v2  ;;  %v3011_v41 = vperm.slane %v626_v35, 0 }
 0x2e1   : > { %v1419_v48 = vmax.f32 %v1262_v44, 0.0  ;;  %v1420_v39 = vmax.f32 %v1351_v45, 0.0  ;;  %vm1447_vm7 = vcmp.eq.s32.totalorder %v3001_v23, %v3011_v41  ;;  %vm1448_vm8 = vcmp.eq.s32.totalorder %v3006_v32, %v3011_v41 }
 0x2e2   : > { %vm2114_vm9 = vmpackc.low %vm1448_vm8, %vm1447_vm7  ;;  %vm1449_vm10 = vcmp.eq.s32.totalorder %v1440_v16, %v3011_v41  ;;  %vm1450_vm11 = vcmp.eq.s32.totalorder %v1441_v17, %v3011_v41 }
 0x2e3   : > { %v2978_v40 = vpack.c.bf16 %v1419_v48, %v1417_v46  ;;  %v2980_v49 = vpack.c.bf16 %v1420_v39, %v1418_v47  ;;  %v611_v47 = vmul.u32 4, %v2998_v19  ;;  %2115 = vmatmul.msk.bf16.vlgmr.msrb.gmra.mxu0 %vm2114_vm9, %v2395_v9  ;;  %2123 = vmatmul.msk.bf16.vlgmr.msrb.gmra.mxu1 %vm2114_vm9, %v2395_v9  ;;  %vm2116_vm14 = vmpackc.low %vm1450_vm11, %vm1449_vm10 }
 0x2e6   : > { %v2982_v50 = vpop.f32.mrf.mxu2  ;;  %v2984_v33 = vpop.f32.mrf.mxu3 }
 0x2e7   : > { %v1265_v25 = vadd.f32 %v2982_v50, %v2870_v1  ;;  %v1354_v26 = vadd.f32 %v2984_v33, %v2872_v2 }
 0x2e9   : > { %v1421_v18 = vmax.f32 %v1265_v25, 0.0 }
 0x2ee   : > { %v2986_v51 = vpop.f32.mrf.mxu2  ;;  %v2988_v34 = vpop.f32.mrf.mxu3 }
 0x2f3   : > { %2117 = vmatmul.msk.bf16.gmra.mxu0 %vm2116_vm14, %v2395_v9  ;;  %2125 = vmatmul.msk.bf16.gmra.mxu1 %vm2116_vm14, %v2395_v9 }
 0x2f6   : > { %v2990_v52 = vpop.f32.mrf.mxu2  ;;  %v2992_v53 = vpop.f32.mrf.mxu3 }
 0x2f7   : > { %v1270_v60 = vadd.f32 %v2990_v52, %v2870_v1  ;;  %v1359_v61 = vadd.f32 %v2992_v53, %v2872_v2 }
 0x2f9   : > { %v1425_v11 = vmax.f32 %v1270_v60, 0.0 }
 0x2fe   : > { %v1271_v5 = vpop.f32.mrf.mxu2  ;;  %v1360_v28 = vpop.f32.mrf.mxu3 }
 0x2ff   : > { %v1272_v55 = vadd.f32 %v1271_v5, %v2870_v1  ;;  %v1361_v29 = vadd.f32 %v1360_v28, %v2872_v2  ;;  %v609_v5 = vmul.u32 16, %v2998_v19  ;;  %v613_v28 = vrot.slane %v611_v47, 1  ;;  %v1497_v47 = vld [vmem:[#allocation2 + $0x30] sm:$0xff] }
 0x301   : > { %v1427_v52 = vmax.f32 %v1272_v55, 0.0  ;;  %v1428_v53 = vmax.f32 %v1361_v29, 0.0 }
 0x303   : > { %v1636_v42 = vpack.c.bf16 %v1427_v52, %v1425_v11  ;;  %v1502_v52 = vld [vmem:[#allocation2 + $0xb8] sm:$0xff]  ;;  %v1646_v11 = vld [vmem:[#allocation2 + $0xc8] sm:$0xff] }
 0x306   : > { %v1274_v56 = vpop.f32.mrf.mxu2  ;;  %v1363_v57 = vpop.f32.mrf.mxu3 }
 0x307   : > { %v1275_v44 = vadd.f32 %v1274_v56, %v2870_v1  ;;  %v1364_v45 = vadd.f32 %v1363_v57, %v2872_v2 }
 0x309   : > { %v1429_v0 = vmax.f32 %v1275_v44, 0.0  ;;  %v1430_v6 = vmax.f32 %v1364_v45, 0.0 }
 0x30e   : > { %v1276_v7 = vpop.f32.mrf.mxu2  ;;  %v1365_v8 = vpop.f32.mrf.mxu3 }
 0x30f   : > { %v1277_v21 = vadd.f32 %v1276_v7, %v2870_v1  ;;  %v1366_v36 = vadd.f32 %v1365_v8, %v2872_v2  ;;  %v1267_v7 = vadd.f32 %v2986_v51, %v2870_v1  ;;  %v1356_v8 = vadd.f32 %v2988_v34, %v2872_v2 }
 0x310   : > { %v1426_v51 = vmax.f32 %v1359_v61, 0.0  ;;  %v615_v34 = vadd.s32 %v613_v28, %v609_v5 }
 0x311   : > { %v1431_v58 = vmax.f32 %v1277_v21, 0.0  ;;  %v1432_v56 = vmax.f32 %v1366_v36, 0.0  ;;  %v1443_v21 = vadd.s32 40, %v3001_v23 }
 0x312   : > { %v1637_v43 = vpack.c.bf16 %v1428_v53, %v1426_v51 }
 0x313   : > { %v1638_v12 = vpack.c.bf16 %v1431_v58, %v1429_v0  ;;  %v1639_v10 = vpack.c.bf16 %v1432_v56, %v1430_v6  ;;  %vm1452_vm4 = vcmp.eq.s32.totalorder %v1443_v21, %v3011_v41  ;;  %v1499_v58 = vld [vmem:[#allocation2 + $0x80] sm:$0xff]  ;;  %v1643_v0 = vld [vmem:[#allocation2 + $0x38] sm:$0xff] }
 0x314   : > { %v1644_v6 = vld [vmem:[#allocation2 + $0x58] sm:$0xff] }
 0x316   : > { %v1279_v14 = vpop.f32.mrf.mxu2  ;;  %v1368_v62 = vpop.f32.mrf.mxu3 }
 0x317   : > { %v1280_v20 = vadd.f32 %v1279_v14, %v2870_v1  ;;  %v1369_v24 = vadd.f32 %v1368_v62, %v2872_v2  ;;  %v1423_v14 = vmax.f32 %v1267_v7, 0.0  ;;  %v1424_v62 = vmax.f32 %v1356_v8, 0.0 }
 0x319   : > { %v1433_v46 = vmax.f32 %v1280_v20, 0.0  ;;  %v1434_v48 = vmax.f32 %v1369_v24, 0.0  ;;  %v1634_v50 = vpack.c.bf16 %v1423_v14, %v1421_v18  ;;  %v1442_v24 = vadd.s32 32, %v3001_v23 }
 0x31b   : > { %vm1451_vm3 = vcmp.eq.s32.totalorder %v1442_v24, %v3011_v41 }
 0x31c   : > { %vm2118_vm6 = vmpackc.low %vm1452_vm4, %vm1451_vm3 }
 0x31d   : > { %2119 = vmatmul.msk.bf16.gmra.mxu0 %vm2118_vm6, %v2395_v9  ;;  %2127 = vmatmul.msk.bf16.gmra.mxu1 %vm2118_vm6, %v2395_v9 }
 0x31e   : > { %v1281_v27 = vpop.f32.mrf.mxu2  ;;  %v1370_v22 = vpop.f32.mrf.mxu3 }
 0x31f   : > { %v1282_v37 = vadd.f32 %v1281_v27, %v2870_v1  ;;  %v1371_v38 = vadd.f32 %v1370_v22, %v2872_v2  ;;  %v1422_v1 = vmax.f32 %v1354_v26, 0.0  ;;  %v619_v2 = vadd.s32 %v617_v13, %v615_v34  ;;  %v1494_v27 = vld [vmem:[#allocation2 + $0x18] sm:$0xff]  ;;  %v1645_v26 = vld [vmem:[#allocation2 + $0x40] sm:$0xff] }
 0x321   : > { %v1435_v39 = vmax.f32 %v1282_v37, 0.0  ;;  %v1436_v54 = vmax.f32 %v1371_v38, 0.0  ;;  %v1635_v33 = vpack.c.bf16 %v1424_v62, %v1422_v1  ;;  %vm621_vm12 = vcmp.ge.s32.totalorder %v619_v2, 0  ;;  %v1495_v37 = vld [vmem:[#allocation2 + $0x50] sm:$0xff]  ;;  %v1503_v62 = vld [vmem:[#allocation2 + $0x60] sm:$0xff] }
 0x322   : > { %vm623_vm13 = vcmp.lt.s32.totalorder %v619_v2, 64  ;;  %v1647_v1 = vld [vmem:[#allocation2 + $0xe0] sm:$0xff] }
 0x323   : > { %v1640_v59 = vpack.c.bf16 %v1435_v39, %v1433_v46  ;;  %v1641_v57 = vpack.c.bf16 %v1436_v54, %v1434_v48  ;;  %vm625_vm15 = vmand %vm621_vm12, %vm623_vm13  ;;  %v1498_v48 = vld [vmem:[#allocation2 + $0x48] sm:$0xff] }
 0x324   : > { %v627_v19 = vsel %vm625_vm15, %v619_v2, 4294967295  ;;  %v1648_v2 = vld [vmem:[#allocation2 + $0x90] sm:$0xff] }
 0x325   : > { %1659 = vmatpush.bf16.msrb.mxu2 %v1640_v59  ;;  %1688 = vmatpush.bf16.msrb.mxu3 %v1641_v57  ;;  %v1597_v20 = vperm.slane %v627_v19, 0  ;;  %v1500_v59 = vld [vmem:[#allocation2 + $0x88] sm:$0xff] }
 0x327   : > { %vm1598_vm1 = vcmp.eq.s32.totalorder %v3001_v23, %v1597_v20  ;;  %vm1599_vm2 = vcmp.eq.s32.totalorder %v3006_v32, %v1597_v20  ;;  %vm1600_vm7 = vcmp.eq.s32.totalorder %v1440_v16, %v1597_v20  ;;  %vm1601_vm8 = vcmp.eq.s32.totalorder %v1441_v17, %v1597_v20 }
 0x328   : > { %vm2138_vm5 = vmpackc.low %vm1599_vm2, %vm1598_vm1  ;;  %vm1602_vm13 = vcmp.eq.s32.totalorder %v1442_v24, %v1597_v20  ;;  %vm1603_vm14 = vcmp.eq.s32.totalorder %v1443_v21, %v1597_v20  ;;  %v1505_v24 = vld [vmem:[#allocation2 + $0x8] sm:$0xff]  ;;  %v1506_v21 = vld [vmem:[#allocation2 + $0x78] sm:$0xff] }
 0x329   : > { %1660 = vmatpush.bf16.msrb.mxu2 %v1638_v12  ;;  %1689 = vmatpush.bf16.msrb.mxu3 %v1639_v10  ;;  %vm2140_vm11 = vmpackc.low %vm1601_vm8, %vm1600_vm7 }
 0x32a   : > { %vm2142_vm15 = vmpackc.low %vm1603_vm14, %vm1602_vm13 }
 0x32d   : > { %1661 = vmatpush.bf16.msrb.mxu2 %v1636_v42  ;;  %1690 = vmatpush.bf16.msrb.mxu3 %v1637_v43  ;;  %v1504_v43 = vld [vmem:[#allocation2 + $0xf0] sm:$0xff] }
 0x331   : > { %1662 = vmatpush.bf16.msrb.mxu2 %v1634_v50  ;;  %1691 = vmatpush.bf16.msrb.mxu3 %v1635_v33 }
 0x335   : > { %1663 = vmatpush.bf16.msrb.mxu2 %v2978_v40  ;;  %1692 = vmatpush.bf16.msrb.mxu3 %v2980_v49 }
 0x339   : > { %1664 = vmatpush.bf16.msrb.mxu2 %v2970_v30  ;;  %1693 = vmatpush.bf16.msrb.mxu3 %v2972_v31 }
 0x33d   : > { %1665 = vmatpush.bf16.msrb.mxu2 %v2962_v63  ;;  %1694 = vmatpush.bf16.msrb.mxu3 %v2964_v15  ;;  %v1444_v63 = vadd.s32 48, %v3001_v23  ;;  %v1445_v15 = vadd.s32 56, %v3001_v23  ;;  %v1493_v23 = vld [vmem:[#allocation2 + $0xd8] sm:$0xff] }
 0x33f   : > { %vm1453_vm9 = vcmp.eq.s32.totalorder %v1444_v63, %v3011_v41  ;;  %vm1454_vm10 = vcmp.eq.s32.totalorder %v1445_v15, %v3011_v41  ;;  %vm1604_vm1 = vcmp.eq.s32.totalorder %v1444_v63, %v1597_v20  ;;  %vm1605_vm2 = vcmp.eq.s32.totalorder %v1445_v15, %v1597_v20  ;;  %v1496_v41 = vld [vmem:[#allocation2 + $0x68] sm:$0xff] }
 0x340   : > { %vm2120_vm12 = vmpackc.low %vm1454_vm10, %vm1453_vm9 }
 0x341   : > { %1666 = vmatpush.bf16.msrb.mxu2 %v2946_v3  ;;  %1695 = vmatpush.bf16.msrb.mxu3 %v2948_v4  ;;  %vm2144_vm3 = vmpackc.low %vm1605_vm2, %vm1604_vm1  ;;  %v1491_v3 = vld [vmem:[#allocation2 + $0xb0] sm:$0xff]  ;;  %v1492_v4 = vld [vmem:[#allocation2] sm:$0xff] }
 0x342   : > { %2121 = vmatmul.msk.bf16.gmra.mxu0 %vm2120_vm12, %v2395_v9  ;;  %2129 = vmatmul.msk.bf16.gmra.mxu1 %vm2120_vm12, %v2395_v9 }
 0x344   : > { %2139 = vmatmul.msk.bf16.vlgmr.msrb.gmra.mxu2 %vm2138_vm5, %v2395_v9  ;;  %2147 = vmatmul.msk.bf16.vlgmr.msrb.gmra.mxu3 %vm2138_vm5, %v2395_v9 }
 0x354   : > { %2141 = vmatmul.msk.bf16.gmra.mxu2 %vm2140_vm11, %v2395_v9  ;;  %2149 = vmatmul.msk.bf16.gmra.mxu3 %vm2140_vm11, %v2395_v9 }
 0x360   : > { %v1516_v30 = vpop.f32.mrf.mxu0  ;;  %v1545_v31 = vpop.f32.mrf.mxu1 }
 0x361   : > { %v1565_v40 = vadd.f32 %v1516_v30, %v1491_v3  ;;  %v1566_v49 = vadd.f32 %v1545_v31, %v1492_v4  ;;  %v1649_v30 = vld [vmem:[#allocation2 + $0x70] sm:$0xff]  ;;  %v1650_v31 = vld [vmem:[#allocation2 + $0xc0] sm:$0xff] }
 0x363   : > { %1581 = vst [vmem:[#allocation2 + $0xb0] sm:$0xff] %v1565_v40 }
 0x364   : > { %2143 = vmatmul.msk.bf16.gmra.mxu2 %vm2142_vm15, %v2395_v9  ;;  %2151 = vmatmul.msk.bf16.gmra.mxu3 %vm2142_vm15, %v2395_v9  ;;  %1582 = vst [vmem:[#allocation2] sm:$0xff] %v1566_v49 }
 0x368   : > { %v1518_v22 = vpop.f32.mrf.mxu0  ;;  %v1547_v32 = vpop.f32.mrf.mxu1 }
 0x369   : > { %v1567_v35 = vadd.f32 %v1518_v22, %v1493_v23  ;;  %v1568_v36 = vadd.f32 %v1547_v32, %v1494_v27  ;;  %v1651_v22 = vld [vmem:[#allocation2 + $0xa8] sm:$0xff]  ;;  %v1652_v32 = vld [vmem:[#allocation2 + $0xd0] sm:$0xff] }
 0x36b   : > { %1583 = vst [vmem:[#allocation2 + $0xd8] sm:$0xff] %v1567_v35 }
 0x36c   : > { %1584 = vst [vmem:[#allocation2 + $0x18] sm:$0xff] %v1568_v36 }
 0x370   : > { %v1521_v38 = vpop.f32.mrf.mxu0  ;;  %v1550_v44 = vpop.f32.mrf.mxu1 }
 0x371   : > { %v1569_v45 = vadd.f32 %v1521_v38, %v1495_v37  ;;  %v1570_v46 = vadd.f32 %v1550_v44, %v1496_v41  ;;  %v1653_v41 = vld [vmem:[#allocation2 + $0x10] sm:$0xff]  ;;  %v1654_v44 = vld [vmem:[#allocation2 + $0x28] sm:$0xff] }
 0x373   : > { %1585 = vst [vmem:[#allocation2 + $0x50] sm:$0xff] %v1569_v45 }
 0x374   : > { %2145 = vmatmul.msk.bf16.gmra.mxu2 %vm2144_vm3, %v2395_v9  ;;  %2153 = vmatmul.msk.bf16.gmra.mxu3 %vm2144_vm3, %v2395_v9  ;;  %1586 = vst [vmem:[#allocation2 + $0x68] sm:$0xff] %v1570_v46  ;;  %v1501_v9 = vld [vmem:[#allocation2 + $0xe8] sm:$0xff] }
 0x378   : > { %v1523_v39 = vpop.f32.mrf.mxu0  ;;  %v1552_v54 = vpop.f32.mrf.mxu1 }
 0x379   : > { %v1571_v55 = vadd.f32 %v1523_v39, %v1497_v47  ;;  %v1572_v29 = vadd.f32 %v1552_v54, %v1498_v48  ;;  %v1655_v39 = vld [vmem:[#allocation2 + $0xa0] sm:$0xff]  ;;  %v1656_v54 = vld [vmem:[#allocation2 + $0xf8] sm:$0xff] }
 0x37b   : > { %1587 = vst [vmem:[#allocation2 + $0x30] sm:$0xff] %v1571_v55 }
 0x37c   : > { %1588 = vst [vmem:[#allocation2 + $0x48] sm:$0xff] %v1572_v29 }
 0x39a   : > { %v1526_v56 = vpop.f32.mrf.mxu0  ;;  %v1555_v57 = vpop.f32.mrf.mxu1 }
 0x39b   : > { %v1573_v60 = vadd.f32 %v1526_v56, %v1499_v58  ;;  %v1574_v61 = vadd.f32 %v1555_v57, %v1500_v59  ;;  %v1657_v59 = vld [vmem:[#allocation2 + $0x20] sm:$0xff]  ;;  %v1658_v57 = vld [vmem:[#allocation2 + $0x98] sm:$0xff] }
 0x39d   : > { %1589 = vst [vmem:[#allocation2 + $0x80] sm:$0xff] %v1573_v60 }
 0x39e   : > { %1590 = vst [vmem:[#allocation2 + $0x88] sm:$0xff] %v1574_v61 }
 0x3a2   : > { %v1528_v53 = vpop.f32.mrf.mxu0  ;;  %v1557_v12 = vpop.f32.mrf.mxu1 }
 0x3a3   : > { %v1575_v10 = vadd.f32 %v1528_v53, %v1501_v9  ;;  %v1576_v25 = vadd.f32 %v1557_v12, %v1502_v52 }
 0x3a5   : > { %1591 = vst [vmem:[#allocation2 + $0xe8] sm:$0xff] %v1575_v10 }
 0x3a6   : > { %1592 = vst [vmem:[#allocation2 + $0xb8] sm:$0xff] %v1576_v25 }
 0x3bf   : > { %v1531_v42 = vpop.f32.mrf.mxu0  ;;  %v1560_v16 = vpop.f32.mrf.mxu1 }
 0x3c0   : > { %v1577_v17 = vadd.f32 %v1531_v42, %v1503_v62  ;;  %v1578_v18 = vadd.f32 %v1560_v16, %v1504_v43 }
 0x3c2   : > { %1593 = vst [vmem:[#allocation2 + $0x60] sm:$0xff] %v1577_v17 }
 0x3c3   : > { %1594 = vst [vmem:[#allocation2 + $0xf0] sm:$0xff] %v1578_v18 }
 0x3c7   : > { %v1668_v5 = vpop.f32.mrf.mxu2  ;;  %v1697_v28 = vpop.f32.mrf.mxu3 }
 0x3c8   : > { %v1717_v7 = vadd.f32 %v1668_v5, %v1643_v0  ;;  %v1718_v8 = vadd.f32 %v1697_v28, %v1644_v6  ;;  %v1533_v63 = vpop.f32.mrf.mxu0  ;;  %v1562_v15 = vpop.f32.mrf.mxu1 }
 0x3c9   : > { %v1579_v3 = vadd.f32 %v1533_v63, %v1505_v24  ;;  %v1580_v4 = vadd.f32 %v1562_v15, %v1506_v21 }
 0x3ca   : > { %1733 = vst [vmem:[#allocation2 + $0x38] sm:$0xff] %v1717_v7 }
 0x3cb   : > { %1734 = vst [vmem:[#allocation2 + $0x58] sm:$0xff] %v1718_v8 }
 0x3cc   : > { %1595 = vst [vmem:[#allocation2 + $0x8] sm:$0xff] %v1579_v3 }
 0x3cd   : > { %1596 = vst [vmem:[#allocation2 + $0x78] sm:$0xff] %v1580_v4 }
 0x3cf   : > { %v1670_v51 = vpop.f32.mrf.mxu2  ;;  %v1699_v34 = vpop.f32.mrf.mxu3 }
 0x3d0   : > { %v1719_v13 = vadd.f32 %v1670_v51, %v1645_v26  ;;  %v1720_v14 = vadd.f32 %v1699_v34, %v1646_v11 }
 0x3d2   : > { %1735 = vst [vmem:[#allocation2 + $0x40] sm:$0xff] %v1719_v13 }
 0x3d3   : > { %1736 = vst [vmem:[#allocation2 + $0xc8] sm:$0xff] %v1720_v14 }
 0x3d7   : > { %v1673_v50 = vpop.f32.mrf.mxu2  ;;  %v1702_v33 = vpop.f32.mrf.mxu3 }
 0x3d8   : > { %v1721_v19 = vadd.f32 %v1673_v50, %v1647_v1  ;;  %v1722_v20 = vadd.f32 %v1702_v33, %v1648_v2 }
 0x3da   : > { %1737 = vst [vmem:[#allocation2 + $0xe0] sm:$0xff] %v1721_v19 }
 0x3db   : > { %1738 = vst [vmem:[#allocation2 + $0x90] sm:$0xff] %v1722_v20 }
 0x3df   : > { %v1675_v40 = vpop.f32.mrf.mxu2  ;;  %v1704_v49 = vpop.f32.mrf.mxu3 }
 0x3e0   : > { %v1723_v23 = vadd.f32 %v1675_v40, %v1649_v30  ;;  %v1724_v27 = vadd.f32 %v1704_v49, %v1650_v31 }
 0x3e2   : > { %1739 = vst [vmem:[#allocation2 + $0x70] sm:$0xff] %v1723_v23 }
 0x3e3   : > { %1740 = vst [vmem:[#allocation2 + $0xc0] sm:$0xff] %v1724_v27 }
 0x3e7   : > { %v1678_v35 = vpop.f32.mrf.mxu2  ;;  %v1707_v36 = vpop.f32.mrf.mxu3 }
 0x3e8   : > { %v1725_v37 = vadd.f32 %v1678_v35, %v1651_v22  ;;  %v1726_v38 = vadd.f32 %v1707_v36, %v1652_v32 }
 0x3ea   : > { %1741 = vst [vmem:[#allocation2 + $0xa8] sm:$0xff] %v1725_v37 }
 0x3eb   : > { %1742 = vst [vmem:[#allocation2 + $0xd0] sm:$0xff] %v1726_v38 }
 0x3ef   : > { %v1680_v45 = vpop.f32.mrf.mxu2  ;;  %v1709_v46 = vpop.f32.mrf.mxu3 }
 0x3f0   : > { %v1727_v47 = vadd.f32 %v1680_v45, %v1653_v41  ;;  %v1728_v48 = vadd.f32 %v1709_v46, %v1654_v44 }
 0x3f2   : > { %1743 = vst [vmem:[#allocation2 + $0x10] sm:$0xff] %v1727_v47 }
 0x3f3   : > { %1744 = vst [vmem:[#allocation2 + $0x28] sm:$0xff] %v1728_v48 }
 0x3f7   : > { %v1683_v55 = vpop.f32.mrf.mxu2  ;;  %v1712_v29 = vpop.f32.mrf.mxu3 }
 0x3f8   : > { %v1729_v58 = vadd.f32 %v1683_v55, %v1655_v39  ;;  %v1730_v56 = vadd.f32 %v1712_v29, %v1656_v54 }
 0x3fa   : > { %1745 = vst [vmem:[#allocation2 + $0xa0] sm:$0xff] %v1729_v58 }
 0x3fb   : > { %1746 = vst [vmem:[#allocation2 + $0xf8] sm:$0xff] %v1730_v56 }
 0x3ff   : > { %v1685_v60 = vpop.f32.mrf.mxu2  ;;  %v1714_v61 = vpop.f32.mrf.mxu3  ;;  %1752 = sbr.rel (%p2154_p4) target bundleno = 1070 (0x42e), region = 139 }
 0x400   : > { %v1731_v0 = vadd.f32 %v1685_v60, %v1657_v59  ;;  %v1732_v6 = vadd.f32 %v1714_v61, %v1658_v57 }
 0x402   : > { %1747 = vst [vmem:[#allocation2 + $0x20] sm:$0xff] %v1731_v0 }
 0x403   : > { %1748 = vst [vmem:[#allocation2 + $0x98] sm:$0xff] %v1732_v6 }
 0x404   : > { %v1753_v5 = vld [vmem:[#allocation2 + $0xb0] sm:$0xff]  ;;  %v1754_v28 = vld [vmem:[#allocation2] sm:$0xff]  ;;  %v1755_v7 = vld [vmem:[#allocation2 + $0xd8] sm:$0xff]  ;;  %vm1850_vm4 = vcmask 1041409   ;;  %vm1852_vm5 = vcmask 1043459   ;;  %vm1854_vm6 = vcmask 1045509  }
 0x405   : > { %v1756_v8 = vld [vmem:[#allocation2 + $0x18] sm:$0xff]  ;;  %v1757_v9 = vld [vmem:[#allocation2 + $0x50] sm:$0xff]  ;;  %v1758_v52 = vld [vmem:[#allocation2 + $0x68] sm:$0xff]  ;;  %v1785_v53 = vmax.f32 %v1753_v5, %v1755_v7  ;;  %vm1856_vm7 = vcmask 1047559  }
 0x406   : > { %v1759_v12 = vld [vmem:[#allocation2 + $0x30] sm:$0xff]  ;;  %v1798_v10 = vmax.f32 %v1754_v28, %v1756_v8  ;;  %v1760_v25 = vld [vmem:[#allocation2 + $0x48] sm:$0xff]  ;;  %v1761_v11 = vld [vmem:[#allocation2 + $0x80] sm:$0xff] }
 0x407   : > { %v1786_v26 = vmax.f32 %v1785_v53, %v1757_v9  ;;  %v1762_v51 = vld [vmem:[#allocation2 + $0x88] sm:$0xff]  ;;  %v1769_v14 = vld [vmem:[#allocation2 + $0x38] sm:$0xff]  ;;  %v1771_v43 = vld [vmem:[#allocation2 + $0x40] sm:$0xff] }
 0x408   : > { %v1799_v34 = vmax.f32 %v1798_v10, %v1758_v52  ;;  %v1763_v13 = vld [vmem:[#allocation2 + $0xe8] sm:$0xff]  ;;  %v1770_v62 = vld [vmem:[#allocation2 + $0x58] sm:$0xff]  ;;  %v1773_v17 = vld [vmem:[#allocation2 + $0xe0] sm:$0xff]  ;;  %v1811_v33 = vmax.f32 %v1769_v14, %v1771_v43 }
 0x409   : > { %v1787_v42 = vmax.f32 %v1786_v26, %v1759_v12  ;;  %v1772_v16 = vld [vmem:[#allocation2 + $0xc8] sm:$0xff]  ;;  %v1764_v1 = vld [vmem:[#allocation2 + $0xb8] sm:$0xff]  ;;  %v1774_v2 = vld [vmem:[#allocation2 + $0x90] sm:$0xff] }
 0x40a   : > { %v1800_v18 = vmax.f32 %v1799_v34, %v1760_v25  ;;  %v1824_v19 = vmax.f32 %v1770_v62, %v1772_v16  ;;  %v1765_v20 = vld [vmem:[#allocation2 + $0x60] sm:$0xff]  ;;  %v1775_v24 = vld [vmem:[#allocation2 + $0x70] sm:$0xff]  ;;  %v1812_v4 = vmax.f32 %v1811_v33, %v1773_v17  ;;  %v1767_v31 = vld [vmem:[#allocation2 + $0x8] sm:$0xff] }
 0x40b   : > { %v1788_v50 = vmax.f32 %v1787_v42, %v1761_v11  ;;  %v1776_v21 = vld [vmem:[#allocation2 + $0xc0] sm:$0xff]  ;;  %v1766_v15 = vld [vmem:[#allocation2 + $0xf0] sm:$0xff]  ;;  %v1777_v40 = vld [vmem:[#allocation2 + $0xa8] sm:$0xff] }
 0x40c   : > { %v1801_v63 = vmax.f32 %v1800_v18, %v1762_v51  ;;  %v1825_v30 = vmax.f32 %v1824_v19, %v1774_v2  ;;  %v1778_v49 = vld [vmem:[#allocation2 + $0xd0] sm:$0xff]  ;;  %v1768_v27 = vld [vmem:[#allocation2 + $0x78] sm:$0xff]  ;;  %v1813_v32 = vmax.f32 %v1812_v4, %v1775_v24  ;;  %v1780_v37 = vld [vmem:[#allocation2 + $0x28] sm:$0xff] }
 0x40d   : > { %v1789_v3 = vmax.f32 %v1788_v50, %v1763_v13  ;;  %v1779_v36 = vld [vmem:[#allocation2 + $0x10] sm:$0xff]  ;;  %v1781_v46 = vld [vmem:[#allocation2 + $0xa0] sm:$0xff]  ;;  %v1782_v47 = vld [vmem:[#allocation2 + $0xf8] sm:$0xff] }
 0x40e   : > { %v1802_v23 = vmax.f32 %v1801_v63, %v1764_v1  ;;  %v1826_v35 = vmax.f32 %v1825_v30, %v1776_v21  ;;  %v1814_v44 = vmax.f32 %v1813_v32, %v1777_v40  ;;  %v1783_v29 = vld [vmem:[#allocation2 + $0x20] sm:$0xff]  ;;  %v1784_v58 = vld [vmem:[#allocation2 + $0x98] sm:$0xff] }
 0x40f   : > { %v1790_v22 = vmax.f32 %v1789_v3, %v1765_v20 }
 0x410   : > { %v1803_v38 = vmax.f32 %v1802_v23, %v1766_v15  ;;  %v1827_v45 = vmax.f32 %v1826_v35, %v1778_v49  ;;  %v1815_v54 = vmax.f32 %v1814_v44, %v1779_v36 }
 0x411   : > { %v1791_v41 = vmax.f32 %v1790_v22, %v1767_v31 }
 0x412   : > { %v1804_v48 = vmax.f32 %v1803_v38, %v1768_v27  ;;  %v1828_v55 = vmax.f32 %v1827_v45, %v1780_v37  ;;  %v1816_v57 = vmax.f32 %v1815_v54, %v1781_v46 }
 0x413   : > { %v1792_v39 = vrot.slane %v1791_v41, 4 }
 0x414   : > { %v1805_v56 = vrot.slane %v1804_v48, 4  ;;  %v1829_v60 = vmax.f32 %v1828_v55, %v1782_v47  ;;  %v1817_v6 = vmax.f32 %v1816_v57, %v1783_v29 }
 0x415   : > { %v1793_v59 = vmax.f32 %v1791_v41, %v1792_v39 }
 0x416   : > { %v1806_v61 = vmax.f32 %v1804_v48, %v1805_v56  ;;  %v1830_v5 = vmax.f32 %v1829_v60, %v1784_v58  ;;  %v1818_v7 = vrot.slane %v1817_v6, 4 }
 0x417   : > { %v1794_v0 = vrot.slane %v1793_v59, 2 }
 0x418   : > { %v1807_v28 = vrot.slane %v1806_v61, 2  ;;  %v1831_v8 = vrot.slane %v1830_v5, 4  ;;  %v1819_v53 = vmax.f32 %v1817_v6, %v1818_v7 }
 0x419   : > { %v1795_v52 = vmax.f32 %v1793_v59, %v1794_v0 }
 0x41a   : > { %v1808_v9 = vmax.f32 %v1806_v61, %v1807_v28  ;;  %v1832_v12 = vmax.f32 %v1830_v5, %v1831_v8  ;;  %v1820_v25 = vrot.slane %v1819_v53, 2 }
 0x41b   : > { %v1796_v11 = vrot.slane %v1795_v52, 1 }
 0x41c   : > { %v1809_v10 = vrot.slane %v1808_v9, 1  ;;  %v1833_v26 = vrot.slane %v1832_v12, 2  ;;  %v1821_v34 = vmax.f32 %v1819_v53, %v1820_v25 }
 0x41d   : > { %v1797_v42 = vmax.f32 %v1795_v52, %v1796_v11 }
 0x41e   : > { %v1810_v51 = vmax.f32 %v1808_v9, %v1809_v10  ;;  %v1834_v13 = vmax.f32 %v1832_v12, %v1833_v26  ;;  %v1822_v14 = vrot.slane %v1821_v34, 1 }
 0x420   : > { %v1835_v62 = vrot.slane %v1834_v13, 1  ;;  %v1823_v43 = vmax.f32 %v1821_v34, %v1822_v14  ;;  %v1841_v17 = vrot.slane %v1810_v51, 6 }
 0x422   : > { %v1836_v16 = vmax.f32 %v1834_v13, %v1835_v62  ;;  %v1843_v1 = vsel %vm730_vm0, %v1797_v42, %v1841_v17 }
 0x424   : > { %v1842_v18 = vrot.slane %v1836_v16, 6 }
 0x426   : > { %v1844_v2 = vsel %vm730_vm0, %v1823_v43, %v1842_v18 }
 0x427   : > { %v1849_v50 = vrot.slane %v1844_v2, 7 }
 0x429   : > { %v1851_v33 = vsel %vm1850_vm4, %v1849_v50, %v1843_v1 }
 0x42a   : > { %v1853_v19 = vsel %vm1852_vm5, %v1849_v50, %v1851_v33 }
 0x42b   : > { %v1855_v20 = vsel %vm1854_vm6, %v1849_v50, %v1853_v19 }
 0x42c   : > { %v1857_v24 = vsel %vm1856_vm7, %v1849_v50, %v1855_v20 }
 0x42d   : > { %1859 = vst [vmem:[%s3156_s10] sm:$0xf] %v1857_v24 }
 0x42e PF: > { %s2182_s18 = sshll.u32 %s2379_s11, 2  ;;  %s3157_s27 = scalar_lea.vmem [#allocation5], %s2624_s0 }
 0x42f   : > { %s1872_s21 = scalar_lea.hbm %s3139_s8, %s2182_s18  ;;  %s1874_s30 = sshll.u32 %s3157_s27, 4  ;;  %s1875_s30 = int_to_ptr.vmem [resolvable:$true] %s1874_s30 }
 0x430   : > { %s1876_s25 = sshll.u32 %s1872_s21, 4  ;;  %s3158_s22 = sand.u32 1, %s2359_s28   ;;  %s1877_s25 = int_to_ptr.hbm [resolvable:$true] %s1876_s25 }
 0x431   : > { %s1861_s19 = scalar_lea.sflag [#allocation6], %s3158_s22  ;;  %s2295_s26 = sshra.s32 %s1877_s25, 4  ;;  %s2296_s26 = int_to_ptr.hbm [resolvable:$true] %s2295_s26 }
 0x432   : > { %s2297_s16 = scalar_lea.hbm %s2296_s26, 4  ;;  %s2301_s1 = scalar_lea.hbm %s3139_s8, 8 }
 0x433   : > { %p2298_p5 = scmp.ne.s32.totalorder %s2296_s26, %s2297_s16  ;;  %p2302_p9 = scmp.lt.s32.totalorder %s2296_s26, %s3139_s8 }
 0x434   : > { %p2303_p10 = scmp.lt.s32.totalorder %s2301_s1, %s2297_s16 }
 0x435   : > { %p2299_p6 = pnand %p2298_p5, %p2513_p7 }
 0x436   : > { %p2304_p11 = por %p2303_p10, %p2302_p9 }
 0x437   : > { %p2300_p8 = pneg %p2299_p6 }
 0x439   : > { %p2305_p13 = pnand %p2304_p11, %p2300_p8 }
 0x43b   : > { %2308 = shalt.err (!%p2305_p13)
}
 0x43c   : > { %2187 = dma.vmem_to_hbm [thread:$0]  (%p2513_p7), %s1875_s30, 64, %s1877_s25, %s1861_s19  }
 0x43d PF: > { %s3159_s0 = sld [smem:[#allocation8_spill]]  ;;  %p2193_p0 = scmp.ge.s32.totalorder %s2391_s14, 2 }
 0x43f   : > { %p2190_p1 = pnand %p2193_p0, %p2521_p12 }
 0x441   : > { %p2191_p2 = pneg %p2190_p1 }
 0x443   : > { %s1888_s21 = sand.u32 1, %s3159_s0  }
 0x444   : > { %s1889_s27 = scalar_lea.sflag [#allocation6], %s1888_s21 }
 0x445   : > { %2350 = dma.done.wait (%p2191_p2), %s1889_s27, 64  }
 0x446   : > { %2352 = vsyncadd (%p2191_p2), %s1889_s27, 4294967232  ;;  %s21_s14 = sadd.s32 1, %s2391_s14   ;;  %s3161_s1 = sld [smem:[#allocation9_spill]] }
 0x447   : > { %p18_p3 = scmp.ge.s32.totalorder %s21_s14, 6   ;;  %s3162_s23 = sld [smem:[#allocation10_spill]] }
 0x448   : > { %s3163_s27 = smov %s2359_s28  ;;  %s3164_s28 = smov %s2363_s29 }
 0x449   : > { %s3165_s29 = smov %s2526_s17  ;;  %s3166_s30 = smov %s2371_s9 }
 0x44a   : > { %s3167_s9 = smov %s2529_s15  ;;  %s3168_s10 = smov %s2383_s12 }
 0x44b   : > { %s3169_s11 = smov %s2387_s13  ;;  %20 = sbr.rel (!%p18_p3) target bundleno = 9 (0x9), region = 188 }
 0x44c   : > { %s3170_s12 = smov %s3161_s1 }
 0x44d   : > { %s3171_s13 = smov %s3162_s23 }
 0x450   :  { %1895 = vsyncpa [#allocation6], 1 }
 0x451   :  { %1897 = vsyncpa [#allocation6 + $0x1], 1 }

</bundles_post_ra>
